<compile_context>
chip_gen: v6e
topology: v6e:2x2x1
jax: 0.10.0
libtpu: 0.0.40
codegen_flags: <defaults>
</compile_context>

<pallas_src>
import inspect

import jax
import jax.numpy as jnp
from jax.experimental import pallas as pl
from jax.experimental.pallas import tpu as pltpu


def _blockspec_supports_pipeline_mode():
    try:
        return hasattr(pl, "Buffered") and (
            "pipeline_mode" in inspect.signature(pl.BlockSpec).parameters)
    except (TypeError, ValueError):
        return False


_HAS_PIPELINE_MODE = _blockspec_supports_pipeline_mode()


# ----------------------------------------------------------------------------
# Pallas kernel: fused 3-layer MLP  (Linear+ReLU, Linear+ReLU, Linear+Sigmoid)
# ----------------------------------------------------------------------------
def mlp_kernel(x_ref, w1_ref, b1_ref, w2_ref, b2_ref, w3_ref, b3_ref, o_ref):
    # x_ref:  (tm, F)    f32  (cast to bf16 in-kernel; avoids a wrapper HBM pass)
    # w1_ref: (F, H1)    bf16 ; b1_ref: (1, H1) f32
    # w2_ref: (H1, H2)   bf16 ; b2_ref: (1, H2) f32
    # w3_ref: (1, H2)    bf16  (fc3 weight as a lane-dense row)
    # b3_ref: (1, 1)     f32 in SMEM
    # o_ref:  (1, tm)    f32  lane-dense sigmoid scores for this row tile
    x = x_ref[...].astype(jnp.bfloat16)
    h1 = jnp.dot(x, w1_ref[...], preferred_element_type=jnp.float32)
    h1 = jnp.maximum(h1 + b1_ref[...], 0.0)                        # f32 ReLU
    h2 = jnp.dot(h1.astype(jnp.bfloat16), w2_ref[...],
                 preferred_element_type=jnp.float32)
    h2 = jnp.maximum(h2 + b2_ref[...], 0.0)                        # f32 ReLU
    # Transpose h2 (XLU; idle slot) so the per-row score lands on the lane axis:
    # (1, H2) @ (H2, tm) -> (1, tm)  -> unmasked lane-dense stores, no 128x padding.
    h2t = h2.T.astype(jnp.bfloat16)                                # (H2, tm)
    s = jnp.dot(w3_ref[...], h2t, preferred_element_type=jnp.float32)  # (1, tm)
    o_ref[...] = jax.nn.sigmoid(s + b3_ref[0, 0])


def mlp_scores(x2d, kparams, *, tm=None, single_buffer_weights=True):
    """Fused MLP over all rows. x2d: (N, F) f32 -> (N,) sigmoid scores (f32)."""
    w1, b1, w2, b2, w3_row, b3 = kparams
    N, F = x2d.shape
    H1 = w1.shape[1]
    H2 = w2.shape[1]

    if tm is None:
        # Big tiles amortize the ~0.35us/grid-step overhead and fill the 256-wide
        # MXU on v6e/v7x; keep >= 2 grid steps when N allows so v7x can shard the
        # "parallel" axis across both TensorCores. v5e's 128-wide MXU is already
        # full at tm=128.
        tm = max(128, min(1024, pl.next_power_of_2(pl.cdiv(N, 2))))

    num_tiles = pl.cdiv(N, tm)
    n_cols = num_tiles * tm

    # Grid-invariant (weight/bias) operands: constant index map; single-buffer them
    # when supported so double-buffering doesn't waste VMEM that could go to tm.
    def const_spec(shape):
        kw = {}
        if single_buffer_weights and _HAS_PIPELINE_MODE:
            kw["pipeline_mode"] = pl.Buffered(1)
        return pl.BlockSpec(shape, lambda i: (0, 0), **kw)

    # Explicit scoped-VMEM limit (generous over-estimate + headroom) so larger tm /
    # F never silently trips the 16 MiB (v5e) / 32 MiB (v6e, v7x) defaults.
    est = (2 * tm * F * 4            # x block, f32, double-buffered
           + tm * F * 2              # in-kernel bf16 copy of x
           + F * H1 * 2 + H1 * 4     # w1 + b1
           + H1 * H2 * 2 + H2 * 4    # w2 + b2
           + H2 * 2 + 4              # w3 row + b3
           + tm * H1 * 4 + tm * H2 * 4 + tm * H2 * 2   # h1, h2, h2t
           + 2 * 2 * tm * 4)         # output row, double-buffered
    vmem_limit = int(min(max(est + (8 << 20), 16 << 20), 56 << 20))

    cost = pl.CostEstimate(
        flops=2 * N * (F * H1 + H1 * H2 + H2),
        transcendentals=N,
        bytes_accessed=N * F * 4 + F * H1 * 2 + H1 * H2 * 2 + N * 4)

    out = pl.pallas_call(
        mlp_kernel,
        out_shape=jax.ShapeDtypeStruct((1, n_cols), jnp.float32),
        grid_spec=pltpu.PrefetchScalarGridSpec(
            num_scalar_prefetch=0,
            grid=(num_tiles,),
            in_specs=[
                pl.BlockSpec((tm, F), lambda i: (i, 0)),            # activations (f32)
                const_spec((F, H1)),                                # fc1 weight (resident)
                const_spec((1, H1)),                                # fc1 bias
                const_spec((H1, H2)),                               # fc2 weight
                const_spec((1, H2)),                                # fc2 bias
                const_spec((1, H2)),                                # fc3 weight row
                pl.BlockSpec(memory_space=pltpu.MemorySpace.SMEM),  # fc3 bias scalar
            ],
            out_specs=pl.BlockSpec((1, tm), lambda i: (0, i)),      # lane-dense scores
        ),
        compiler_params=pltpu.CompilerParams(
            dimension_semantics=("parallel",),
            vmem_limit_bytes=vmem_limit),
        cost_estimate=cost,
    )(x2d, w1, b1, w2, b2, w3_row, b3)

    # Columns [N, n_cols) are scores of out-of-range (boundary) rows; rows are
    # independent so they are simply dropped here.
    return out[0, :N]                                               # (N,) scores


# ----------------------------------------------------------------------------
# Parameter init (matches weight_init: xavier_uniform_ weights, zero biases)
# ----------------------------------------------------------------------------
def xavier_uniform(key, fan_in, fan_out):
    bound = (6.0 / (fan_in + fan_out)) ** 0.5
    return jax.random.uniform(key, (fan_in, fan_out), jnp.float32, -bound, bound)


def init_params(key, n_features):
    k1, k2, k3 = jax.random.split(key, 3)
    w1 = xavier_uniform(k1, n_features, 512)
    b1 = jnp.zeros((512,), jnp.float32)
    w2 = xavier_uniform(k2, 512, 128)
    b2 = jnp.zeros((128,), jnp.float32)
    w3 = xavier_uniform(k3, 128, 1)
    b3 = jnp.zeros((1,), jnp.float32)
    return (w1, b1, w2, b2, w3, b3)


def prepare_params(params):
    """One-time transform of f32 masters into kernel operands (hoisted out of the
    forward): bf16 MXU weights, f32 biases as (1, H) rows, fc3 weight as a
    lane-dense (1, H2) row, fc3 bias as a (1, 1) SMEM scalar."""
    w1, b1, w2, b2, w3, b3 = params
    return (w1.astype(jnp.bfloat16),
            b1.reshape(1, -1).astype(jnp.float32),
            w2.astype(jnp.bfloat16),
            b2.reshape(1, -1).astype(jnp.float32),
            w3.reshape(1, -1).astype(jnp.bfloat16),
            b3.reshape(1, 1).astype(jnp.float32))


# ----------------------------------------------------------------------------
# SimpleModel.forward glue (reshape / crop mean / normal-abnormal split)
# ----------------------------------------------------------------------------
def simple_model_forward(inputs, kparams, batch_size, *, single_buffer_weights=True):
    """inputs: (bs, ncrops, t, f) f32 -> (score_abnormal, score_normal, scores)."""
    bs, ncrops, t, f = inputs.shape
    x2d = inputs.reshape(bs * ncrops * t, f)

    # TODO(synk): nn.Dropout(0.7) is treated as identity (eval-mode semantics).
    s = mlp_scores(x2d, kparams,
                   single_buffer_weights=single_buffer_weights)    # (bs*ncrops*t,)

    # TODO(synk): the ncrops-mean could be fused into the kernel epilogue, but the
    # crops of one (video, segment) live in strided rows; kept as a tiny XLA reduce.
    scores = s.reshape(bs, ncrops, t).mean(axis=1)   # (bs, t)  == view(bs,ncrops,-1).mean(1)
    scores = scores[:, :, None]                      # (bs, t, 1) == unsqueeze(dim=2)

    normal_scores = scores[:batch_size]
    abnormal_scores = scores[batch_size:]
    if normal_scores.shape[0] == 1:                  # static-shape branch, as in PyTorch
        abnormal_scores = normal_scores

    score_normal = jnp.mean(normal_scores, axis=1)       # (batch_size, 1)
    score_abnormal = jnp.mean(abnormal_scores, axis=1)   # (bs - batch_size, 1)
    return score_abnormal, score_normal, scores


def simple_model_forward_ref(inputs, params, batch_size):
    """Pure-JAX f32 reference of SimpleModel.forward (for tolerance validation)."""
    w1, b1, w2, b2, w3, b3 = params
    bs, ncrops, t, f = inputs.shape
    x = inputs.reshape(bs * ncrops * t, f)
    h1 = jnp.maximum(x @ w1 + b1.reshape(1, -1), 0.0)
    h2 = jnp.maximum(h1 @ w2 + b2.reshape(1, -1), 0.0)
    s = jax.nn.sigmoid(h2 @ w3 + b3.reshape(1, -1))
    scores = s.reshape(bs, ncrops, t).mean(axis=1)[:, :, None]
    normal = scores[:batch_size]
    abnormal = scores[batch_size:]
    if normal.shape[0] == 1:
        abnormal = normal
    return jnp.mean(abnormal, axis=1), jnp.mean(normal, axis=1), scores


# ----------------------------------------------------------------------------
if __name__ == "__main__":
    key = jax.random.PRNGKey(0)
    k_in, k_par = jax.random.split(key)

    # Small shapes consistent with the module: t = num_segments = 32.
    bs, ncrops, t, n_features = 4, 2, 32, 256
    batch_size = 2   # first `batch_size` videos are normal, rest abnormal

    inputs = jax.random.normal(k_in, (bs, ncrops, t, n_features), jnp.float32)
    params = init_params(k_par, n_features)
    kparams = prepare_params(params)     # one-time weight prep, outside the jit

    def make_fwd(single_buffer):
        return jax.jit(lambda x, p: simple_model_forward(
            x, p, batch_size, single_buffer_weights=single_buffer))

    fwd = make_fwd(True)
    try:
        score_abnormal, score_normal, scores = fwd(inputs, kparams)
        jax.block_until_ready((score_abnormal, score_normal, scores))
    except Exception:
        # Fallback if this jax build rejects pipeline_mode=pl.Buffered(1) on
        # pallas_call BlockSpecs.
        fwd = make_fwd(False)
        score_abnormal, score_normal, scores = fwd(inputs, kparams)
        jax.block_until_ready((score_abnormal, score_normal, scores))

    # Validate against the pure-JAX f32 reference (bf16 MXU operands -> tolerance).
    ref_abn, ref_nor, ref_scores = jax.jit(
        lambda x, p: simple_model_forward_ref(x, p, batch_size))(inputs, params)
    jax.block_until_ready((ref_abn, ref_nor, ref_scores))

    assert score_abnormal.shape == (bs - batch_size, 1)
    assert score_normal.shape == (batch_size, 1)
    assert scores.shape == (bs, t, 1)
    assert bool(jnp.all(jnp.isfinite(scores)))
    assert float(jnp.max(jnp.abs(scores - ref_scores))) < 2e-2
    assert float(jnp.max(jnp.abs(score_abnormal - ref_abn))) < 2e-2
    assert float(jnp.max(jnp.abs(score_normal - ref_nor))) < 2e-2
    print("KERNEL_OK")
</pallas_src>

<mosaic_0001>
module attributes {stable_mosaic.version = 11 : i64} {
  func.func @mlp_kernel(%arg0: i32, %arg1: memref<128x256xf32, #tpu.memory_space<vmem>>, %arg2: memref<256x512xbf16, #tpu.memory_space<vmem>>, %arg3: memref<1x512xf32, #tpu.memory_space<vmem>>, %arg4: memref<512x128xbf16, #tpu.memory_space<vmem>>, %arg5: memref<1x128xf32, #tpu.memory_space<vmem>>, %arg6: memref<1x128xbf16, #tpu.memory_space<vmem>>, %arg7: memref<1x1xf32, #tpu.memory_space<smem>>, %arg8: memref<1x128xf32, #tpu.memory_space<vmem>>) attributes {dimension_semantics = [#tpu.dimension_semantics<parallel>], iteration_bounds = array<i64: 2>, scalar_prefetch = 0 : i64, scratch_operands = 0 : i64, tpu.core_type = #tpu.core_type<tc>, window_params = [{transform_indices = @transform_0, window_bounds = array<i64: 128, 256>}, {pipeline_mode = #tpu.pipeline_mode<synchronous>, transform_indices = @transform_1, window_bounds = array<i64: 256, 512>}, {pipeline_mode = #tpu.pipeline_mode<synchronous>, transform_indices = @transform_2, window_bounds = array<i64: 1, 512>}, {pipeline_mode = #tpu.pipeline_mode<synchronous>, transform_indices = @transform_3, window_bounds = array<i64: 512, 128>}, {pipeline_mode = #tpu.pipeline_mode<synchronous>, transform_indices = @transform_4, window_bounds = array<i64: 1, 128>}, {pipeline_mode = #tpu.pipeline_mode<synchronous>, transform_indices = @transform_5, window_bounds = array<i64: 1, 128>}, {transform_indices = @transform_6, window_bounds = array<i64: 1, 1>}, {transform_indices = @transform_7, window_bounds = array<i64: 1, 128>}]} {
    %c0 = arith.constant 0 : index
    %c0_0 = arith.constant 0 : index
    %0 = vector.load %arg1[%c0, %c0_0] : memref<128x256xf32, #tpu.memory_space<vmem>>, vector<128x256xf32>
    %1 = arith.truncf %0 : vector<128x256xf32> to vector<128x256xbf16>
    %c0_1 = arith.constant 0 : index
    %c0_2 = arith.constant 0 : index
    %2 = vector.load %arg2[%c0_1, %c0_2] : memref<256x512xbf16, #tpu.memory_space<vmem>>, vector<256x512xbf16>
    %cst = arith.constant dense<0.000000e+00> : vector<128x512xf32>
    %3 = tpu.matmul %1, %2, %cst {dimension_numbers = #tpu.dot_dimension_numbers<[1], [0], [0], [1], [0, 0, 1, 1], [], []>} : vector<128x256xbf16>, vector<256x512xbf16>, vector<128x512xf32> -> vector<128x512xf32>
    %c0_3 = arith.constant 0 : index
    %c0_4 = arith.constant 0 : index
    %4 = vector.load %arg3[%c0_3, %c0_4] : memref<1x512xf32, #tpu.memory_space<vmem>>, vector<1x512xf32>
    %5 = vector.broadcast %4 : vector<1x512xf32> to vector<128x512xf32>
    %6 = arith.addf %3, %5 : vector<128x512xf32>
    %cst_5 = arith.constant 0.000000e+00 : f32
    %7 = vector.broadcast %cst_5 : f32 to vector<128x512xf32>
    %8 = arith.maximumf %6, %7 : vector<128x512xf32>
    %9 = arith.truncf %8 : vector<128x512xf32> to vector<128x512xbf16>
    %c0_6 = arith.constant 0 : index
    %c0_7 = arith.constant 0 : index
    %10 = vector.load %arg4[%c0_6, %c0_7] : memref<512x128xbf16, #tpu.memory_space<vmem>>, vector<512x128xbf16>
    %cst_8 = arith.constant dense<0.000000e+00> : vector<128x128xf32>
    %11 = tpu.matmul %9, %10, %cst_8 {dimension_numbers = #tpu.dot_dimension_numbers<[1], [0], [0], [1], [0, 0, 1, 1], [], []>} : vector<128x512xbf16>, vector<512x128xbf16>, vector<128x128xf32> -> vector<128x128xf32>
    %c0_9 = arith.constant 0 : index
    %c0_10 = arith.constant 0 : index
    %12 = vector.load %arg5[%c0_9, %c0_10] : memref<1x128xf32, #tpu.memory_space<vmem>>, vector<1x128xf32>
    %13 = vector.broadcast %12 : vector<1x128xf32> to vector<128x128xf32>
    %14 = arith.addf %11, %13 : vector<128x128xf32>
    %cst_11 = arith.constant 0.000000e+00 : f32
    %15 = vector.broadcast %cst_11 : f32 to vector<128x128xf32>
    %16 = arith.maximumf %14, %15 : vector<128x128xf32>
    %17 = tpu.transpose %16, [1, 0] : vector<128x128xf32> -> vector<128x128xf32>
    %18 = arith.truncf %17 : vector<128x128xf32> to vector<128x128xbf16>
    %c0_12 = arith.constant 0 : index
    %c0_13 = arith.constant 0 : index
    %19 = vector.load %arg6[%c0_12, %c0_13] : memref<1x128xbf16, #tpu.memory_space<vmem>>, vector<1x128xbf16>
    %cst_14 = arith.constant dense<0.000000e+00> : vector<1x128xf32>
    %20 = tpu.matmul %19, %18, %cst_14 {dimension_numbers = #tpu.dot_dimension_numbers<[1], [0], [0], [1], [0, 0, 1, 1], [], []>} : vector<1x128xbf16>, vector<128x128xbf16>, vector<1x128xf32> -> vector<1x128xf32>
    %c0_15 = arith.constant 0 : index
    %c0_16 = arith.constant 0 : index
    %21 = memref.load %arg7[%c0_15, %c0_16] : memref<1x1xf32, #tpu.memory_space<smem>>
    %22 = vector.broadcast %21 : f32 to vector<1x128xf32>
    %23 = arith.addf %20, %22 : vector<1x128xf32>
    %24 = arith.negf %23 : vector<1x128xf32>
    %25 = math.exp %24 : vector<1x128xf32>
    %cst_17 = arith.constant 1.000000e+00 : f32
    %26 = vector.broadcast %cst_17 : f32 to vector<1x128xf32>
    %27 = arith.addf %26, %25 : vector<1x128xf32>
    %28 = arith.divf %26, %27 : vector<1x128xf32>
    %c0_18 = arith.constant 0 : index
    %c0_19 = arith.constant 0 : index
    %29 = vector.load %arg8[%c0_18, %c0_19] : memref<1x128xf32, #tpu.memory_space<vmem>>, vector<1x128xf32>
    tpu.vector_store %arg8[%c0_18, %c0_19], %28 {strides = array<i32>} : memref<1x128xf32, #tpu.memory_space<vmem>>, vector<1x128xf32>,
    return
  }
  func.func @transform_0(%arg0: i32) -> (i32, i32) {
    %c0_i32 = arith.constant 0 : i32
    %c0_i32_0 = arith.constant 0 : i32
    return %arg0, %c0_i32 : i32, i32
  }
  func.func @transform_1(%arg0: i32) -> (i32, i32) {
    %c0_i32 = arith.constant 0 : i32
    %c0_i32_0 = arith.constant 0 : i32
    %c0_i32_1 = arith.constant 0 : i32
    return %c0_i32, %c0_i32_0 : i32, i32
  }
  func.func @transform_2(%arg0: i32) -> (i32, i32) {
    %c0_i32 = arith.constant 0 : i32
    %c0_i32_0 = arith.constant 0 : i32
    %c0_i32_1 = arith.constant 0 : i32
    return %c0_i32, %c0_i32_0 : i32, i32
  }
  func.func @transform_3(%arg0: i32) -> (i32, i32) {
    %c0_i32 = arith.constant 0 : i32
    %c0_i32_0 = arith.constant 0 : i32
    %c0_i32_1 = arith.constant 0 : i32
    return %c0_i32, %c0_i32_0 : i32, i32
  }
  func.func @transform_4(%arg0: i32) -> (i32, i32) {
    %c0_i32 = arith.constant 0 : i32
    %c0_i32_0 = arith.constant 0 : i32
    %c0_i32_1 = arith.constant 0 : i32
    return %c0_i32, %c0_i32_0 : i32, i32
  }
  func.func @transform_5(%arg0: i32) -> (i32, i32) {
    %c0_i32 = arith.constant 0 : i32
    %c0_i32_0 = arith.constant 0 : i32
    %c0_i32_1 = arith.constant 0 : i32
    return %c0_i32, %c0_i32_0 : i32, i32
  }
  func.func @transform_6(%arg0: i32) -> (i32, i32) {
    %c0_i32 = arith.constant 0 : i32
    %c0_i32_0 = arith.constant 0 : i32
    %c0_i32_1 = arith.constant 0 : i32
    return %c0_i32, %c0_i32_0 : i32, i32
  }
  func.func @transform_7(%arg0: i32) -> (i32, i32) {
    %c0_i32 = arith.constant 0 : i32
    %c0_i32_0 = arith.constant 0 : i32
    return %c0_i32, %arg0 : i32, i32
  }
}

module attributes {stable_mosaic.version = 11 : i64} {
  func.func @mlp_kernel(%arg0: i32, %arg1: memref<128x256xf32, #tpu.memory_space<vmem>>, %arg2: memref<256x512xbf16, #tpu.memory_space<vmem>>, %arg3: memref<1x512xf32, #tpu.memory_space<vmem>>, %arg4: memref<512x128xbf16, #tpu.memory_space<vmem>>, %arg5: memref<1x128xf32, #tpu.memory_space<vmem>>, %arg6: memref<1x128xbf16, #tpu.memory_space<vmem>>, %arg7: memref<1x1xf32, #tpu.memory_space<smem>>, %arg8: memref<1x128xf32, #tpu.memory_space<vmem>>) attributes {dimension_semantics = [#tpu.dimension_semantics<parallel>], iteration_bounds = array<i64: 2>, scalar_prefetch = 0 : i64, scratch_operands = 0 : i64, tpu.core_type = #tpu.core_type<tc>, window_params = [{transform_indices = @transform_0, window_bounds = array<i64: 128, 256>}, {pipeline_mode = #tpu.pipeline_mode<synchronous>, transform_indices = @transform_1, window_bounds = array<i64: 256, 512>}, {pipeline_mode = #tpu.pipeline_mode<synchronous>, transform_indices = @transform_2, window_bounds = array<i64: 1, 512>}, {pipeline_mode = #tpu.pipeline_mode<synchronous>, transform_indices = @transform_3, window_bounds = array<i64: 512, 128>}, {pipeline_mode = #tpu.pipeline_mode<synchronous>, transform_indices = @transform_4, window_bounds = array<i64: 1, 128>}, {pipeline_mode = #tpu.pipeline_mode<synchronous>, transform_indices = @transform_5, window_bounds = array<i64: 1, 128>}, {transform_indices = @transform_6, window_bounds = array<i64: 1, 1>}, {transform_indices = @transform_7, window_bounds = array<i64: 1, 128>}]} {
    %c0 = arith.constant 0 : index
    %c0_0 = arith.constant 0 : index
    %0 = vector.load %arg1[%c0, %c0_0] : memref<128x256xf32, #tpu.memory_space<vmem>>, vector<128x256xf32>
    %1 = arith.truncf %0 : vector<128x256xf32> to vector<128x256xbf16>
    %c0_1 = arith.constant 0 : index
    %c0_2 = arith.constant 0 : index
    %2 = vector.load %arg2[%c0_1, %c0_2] : memref<256x512xbf16, #tpu.memory_space<vmem>>, vector<256x512xbf16>
    %cst = arith.constant dense<0.000000e+00> : vector<128x512xf32>
    %3 = tpu.matmul %1, %2, %cst {dimension_numbers = #tpu.dot_dimension_numbers<[1], [0], [0], [1], [0, 0, 1, 1], [], []>} : vector<128x256xbf16>, vector<256x512xbf16>, vector<128x512xf32> -> vector<128x512xf32>
    %c0_3 = arith.constant 0 : index
    %c0_4 = arith.constant 0 : index
    %4 = vector.load %arg3[%c0_3, %c0_4] : memref<1x512xf32, #tpu.memory_space<vmem>>, vector<1x512xf32>
    %5 = vector.broadcast %4 : vector<1x512xf32> to vector<128x512xf32>
    %6 = arith.addf %3, %5 : vector<128x512xf32>
    %cst_5 = arith.constant 0.000000e+00 : f32
    %7 = vector.broadcast %cst_5 : f32 to vector<128x512xf32>
    %8 = arith.maximumf %6, %7 : vector<128x512xf32>
    %9 = arith.truncf %8 : vector<128x512xf32> to vector<128x512xbf16>
    %c0_6 = arith.constant 0 : index
    %c0_7 = arith.constant 0 : index
    %10 = vector.load %arg4[%c0_6, %c0_7] : memref<512x128xbf16, #tpu.memory_space<vmem>>, vector<512x128xbf16>
    %cst_8 = arith.constant dense<0.000000e+00> : vector<128x128xf32>
    %11 = tpu.matmul %9, %10, %cst_8 {dimension_numbers = #tpu.dot_dimension_numbers<[1], [0], [0], [1], [0, 0, 1, 1], [], []>} : vector<128x512xbf16>, vector<512x128xbf16>, vector<128x128xf32> -> vector<128x128xf32>
    %c0_9 = arith.constant 0 : index
    %c0_10 = arith.constant 0 : index
    %12 = vector.load %arg5[%c0_9, %c0_10] : memref<1x128xf32, #tpu.memory_space<vmem>>, vector<1x128xf32>
    %13 = vector.broadcast %12 : vector<1x128xf32> to vector<128x128xf32>
    %14 = arith.addf %11, %13 : vector<128x128xf32>
    %cst_11 = arith.constant 0.000000e+00 : f32
    %15 = vector.broadcast %cst_11 : f32 to vector<128x128xf32>
    %16 = arith.maximumf %14, %15 : vector<128x128xf32>
    %17 = tpu.transpose %16, [1, 0] : vector<128x128xf32> -> vector<128x128xf32>
    %18 = arith.truncf %17 : vector<128x128xf32> to vector<128x128xbf16>
    %c0_12 = arith.constant 0 : index
    %c0_13 = arith.constant 0 : index
    %19 = vector.load %arg6[%c0_12, %c0_13] : memref<1x128xbf16, #tpu.memory_space<vmem>>, vector<1x128xbf16>
    %cst_14 = arith.constant dense<0.000000e+00> : vector<1x128xf32>
    %20 = tpu.matmul %19, %18, %cst_14 {dimension_numbers = #tpu.dot_dimension_numbers<[1], [0], [0], [1], [0, 0, 1, 1], [], []>} : vector<1x128xbf16>, vector<128x128xbf16>, vector<1x128xf32> -> vector<1x128xf32>
    %c0_15 = arith.constant 0 : index
    %c0_16 = arith.constant 0 : index
    %21 = memref.load %arg7[%c0_15, %c0_16] : memref<1x1xf32, #tpu.memory_space<smem>>
    %22 = vector.broadcast %21 : f32 to vector<1x128xf32>
    %23 = arith.addf %20, %22 : vector<1x128xf32>
    %24 = arith.negf %23 : vector<1x128xf32>
    %25 = math.exp %24 : vector<1x128xf32>
    %cst_17 = arith.constant 1.000000e+00 : f32
    %26 = vector.broadcast %cst_17 : f32 to vector<1x128xf32>
    %27 = arith.addf %26, %25 : vector<1x128xf32>
    %28 = arith.divf %26, %27 : vector<1x128xf32>
    %c0_18 = arith.constant 0 : index
    %c0_19 = arith.constant 0 : index
    %29 = vector.load %arg8[%c0_18, %c0_19] : memref<1x128xf32, #tpu.memory_space<vmem>>, vector<1x128xf32>
    tpu.vector_store %arg8[%c0_18, %c0_19], %28 {strides = array<i32>} : memref<1x128xf32, #tpu.memory_space<vmem>>, vector<1x128xf32>,
    return
  }
  func.func @transform_0(%arg0: i32) -> (i32, i32) {
    %c0_i32 = arith.constant 0 : i32
    %c0_i32_0 = arith.constant 0 : i32
    return %arg0, %c0_i32 : i32, i32
  }
  func.func @transform_1(%arg0: i32) -> (i32, i32) {
    %c0_i32 = arith.constant 0 : i32
    %c0_i32_0 = arith.constant 0 : i32
    %c0_i32_1 = arith.constant 0 : i32
    return %c0_i32, %c0_i32_0 : i32, i32
  }
  func.func @transform_2(%arg0: i32) -> (i32, i32) {
    %c0_i32 = arith.constant 0 : i32
    %c0_i32_0 = arith.constant 0 : i32
    %c0_i32_1 = arith.constant 0 : i32
    return %c0_i32, %c0_i32_0 : i32, i32
  }
  func.func @transform_3(%arg0: i32) -> (i32, i32) {
    %c0_i32 = arith.constant 0 : i32
    %c0_i32_0 = arith.constant 0 : i32
    %c0_i32_1 = arith.constant 0 : i32
    return %c0_i32, %c0_i32_0 : i32, i32
  }
  func.func @transform_4(%arg0: i32) -> (i32, i32) {
    %c0_i32 = arith.constant 0 : i32
    %c0_i32_0 = arith.constant 0 : i32
    %c0_i32_1 = arith.constant 0 : i32
    return %c0_i32, %c0_i32_0 : i32, i32
  }
  func.func @transform_5(%arg0: i32) -> (i32, i32) {
    %c0_i32 = arith.constant 0 : i32
    %c0_i32_0 = arith.constant 0 : i32
    %c0_i32_1 = arith.constant 0 : i32
    return %c0_i32, %c0_i32_0 : i32, i32
  }
  func.func @transform_6(%arg0: i32) -> (i32, i32) {
    %c0_i32 = arith.constant 0 : i32
    %c0_i32_0 = arith.constant 0 : i32
    %c0_i32_1 = arith.constant 0 : i32
    return %c0_i32, %c0_i32_0 : i32, i32
  }
  func.func @transform_7(%arg0: i32) -> (i32, i32) {
    %c0_i32 = arith.constant 0 : i32
    %c0_i32_0 = arith.constant 0 : i32
    return %c0_i32, %arg0 : i32, i32
  }
}

</mosaic_0001>

<bundles_post_ra>
// kernel: squeeze.1
= control target key start
LH: loop header
LB: loop body
LE: loop exit
PB: predicated region body
PF: predicated region fallthrough
CT: control target
= control target key end

     0   :  { %vm8_vm0 = vcmask 261120   ;;  %s65_s8 = smov 32   ;;  %s66_s9 = smov 64   ;;  %s96_s0 = inlined_call_operand.vmem [shape: f32[256], index: 0, kind: input, shape index: {}]   ;;  %s97_s1 = inlined_call_operand.vmem [shape: f32[4,2,32], index: 1, kind: output, shape index: {}]  }
   0x1   :  { %v5_v0 = vld [vmem:[%s96_s0] sm:$0x3]  ;;  %s64_s0 = smov 96  }
   0x2   :  { %6 = vst [vmem:[#allocation1] sm:$0x3] %v5_v0 }
   0x9   :  { %v10_v1 = vld [vmem:[#allocation1] sm:$0x3]  }
   0xa   :  { %v22_v2 = vld [vmem:[#allocation1] sm:$0x3]   ;;  %11 = vrot.lane.b32.xlu0 %v10_v1, %s64_s0 }
   0xb   :  { %23 = vrot.lane.b32.xlu1 %v22_v2, %s65_s8  ;;  %v7_v3 = vld [vmem:[#allocation1] sm:$0x3]  }
   0xc   :  { %v16_v4 = vld [vmem:[#allocation1] sm:$0x3]   ;;  %9 = vst.msk [vmem:[#allocation0] ss:$16 sm:$0x3] %vm8_vm0, %v7_v3  }
   0xe   :  { %17 = vrot.lane.b32.xlu0 %v16_v4, %s66_s9 }
  0x7c   :  { %v12_v5 = vpop.permute.xlu0 %11  }
  0x7d   :  { %v24_v6 = vpop.permute.xlu1 %23   ;;  %15 = vst.msk [vmem:[#allocation0 + $0x1] ss:$16 sm:$0x3] %vm8_vm0, %v12_v5  }
  0x7e   :  { %27 = vst.msk [vmem:[#allocation0 + $0x9] ss:$16 sm:$0x3] %vm8_vm0, %v24_v6  }
  0x80   :  { %v18_v7 = vpop.permute.xlu0 %17  }
  0x81   :  { %21 = vst.msk [vmem:[#allocation0 + $0x8] ss:$16 sm:$0x3] %vm8_vm0, %v18_v7  }
  0x84   :  { %v32_v8 = vld [vmem:[#allocation0] sm:$0x3]  ;;  %v43_v9 = vld [vmem:[#allocation0 + $0x10] sm:$0x3] }
  0x85   :  { %35 = vst [vmem:[%s97_s1] sm:$0x3] %v32_v8  ;;  %59 = vst [vmem:[%s97_s1 + $0x4] sm:$0x3] %v43_v9 }
  0x88   :  { %v37_v10 = vld [vmem:[#allocation0 + $0x8] sm:$0x3]  ;;  %v50_v11 = vld [vmem:[#allocation0 + $0x18] sm:$0x3] }
  0x89   :  { %58 = vst [vmem:[%s97_s1 + $0x2] sm:$0x3] %v37_v10  ;;  %60 = vst [vmem:[%s97_s1 + $0x6] sm:$0x3] %v50_v11 }

// kernel: _lambda_.1
= control target key start
LH: loop header
LB: loop body
LE: loop exit
PB: predicated region body
PF: predicated region fallthrough
CT: control target
= control target key end

     0   :  { %s2663_s0 = inlined_call_operand.hbm [shape: f32[256,256], index: 0, kind: input, shape index: {}]   ;;  %s2664_s1 = inlined_call_operand.hbm [shape: bf16[256,512], index: 1, kind: input, shape index: {}]   ;;  %s2665_s2 = inlined_call_operand.vmem [shape: f32[1,512], index: 2, kind: input, shape index: {}]   ;;  %s2666_s3 = inlined_call_operand.hbm [shape: bf16[512,128], index: 3, kind: input, shape index: {}]   ;;  %s2667_s4 = inlined_call_operand.vmem [shape: f32[1,128], index: 4, kind: input, shape index: {}]   ;;  %s2668_s5 = inlined_call_operand.vmem [shape: bf16[1,128], index: 5, kind: input, shape index: {}]   ;;  %s2669_s6 = inlined_call_operand.<no memory space> [shape: f32[1,1], index: 6, kind: input, shape index: {}]   ;;  %s2670_s7 = inlined_call_operand.vmem [shape: f32[1,256], index: 7, kind: output, shape index: {}]  }
   0x1   :  { %12 = sst [smem:[#allocation2]] %s2669_s6 }
   0x2   :  { %13 = vsyncpa [#allocation4], 0 }
   0x3   :  { %15 = vsyncpa [#allocation4 + $0x1], 0 }
   0x4   :  { %16 = vsyncpa [#allocation6], 0  ;;  %s2387_s26 = smov 0   ;;  %s2389_s27 = smov 0  }
   0x5   :  { %s2391_s28 = smov 0   ;;  %s2393_s29 = smov 0  }
   0x6 LB: > { %s2406_s6 = sadd.s32 4294967295, %s2333_s29   ;;  %p42_p0 = scmp.ne.s32.totalorder %s2325_s27, %s2321_s26  ;;  %s2333_s29 = sphi %s2393_s29, %s2685_s29   ;;  %s2329_s28 = sphi %s2391_s28, %s2684_s28   ;;  %s2325_s27 = sphi %s2389_s27, %s2683_s27   ;;  %s2321_s26 = sphi %s2387_s26, %s2682_s26  }
   0x7   : > { %p2671_p1 = scmp.eq.s32.totalorder %s2406_s6, 0  ;;  %p1746_p2 = scmp.ge.s32.totalorder %s2333_s29, 1 }
   0x8   : > { %p205_p3 = scmp.lt.s32.totalorder %s2333_s29, 3  ;;  %s2335_s9 = smov [#allocation5]  }
   0x9   : > { %p2414_p4 = por %p2671_p1, %p42_p0  ;;  %s217_s10 = sshll.u32 %s2335_s9, 4  ;;  %s218_s10 = int_to_ptr.vmem [resolvable:$true] %s217_s10 }
   0xa   : > { %p2418_p5 = pnand %p1746_p2, %p205_p3  ;;  %s2336_s12 = smov [#allocation7]  }
   0xb   : > { %s2674_s30 = scalar_select %p2414_p4, 1, 0 }
   0xc   : > { %s2675_s8 = scalar_select %p2418_p5, 1, 0 }
   0xd   : > { %p2027_p6 = pneg %p2418_p5  ;;  %s233_s13 = sshll.u32 %s2336_s12, 4  ;;  %s234_s13 = int_to_ptr.vmem [resolvable:$true] %s233_s13 }
   0xe   : > { %s2226_s14 = scalar_lea.vmem %s218_s10, 8192  ;;  %p2234_p12 = scmp.lt.s32.totalorder %s218_s10, %s218_s10 }
   0xf   : > { %p2426_p7 = pnand %p2027_p6, %p2671_p1  ;;  %p2227_p9 = scmp.ne.s32.totalorder %s218_s10, %s2226_s14 }
  0x10   : > { %p2235_p13 = scmp.lt.s32.totalorder %s2226_s14, %s2226_s14 }
  0x11   : > { %p2217_p8 = pneg %p2426_p7 }
  0x12   : > { %p2236_p0 = por %p2235_p13, %p2234_p12 }
  0x13   : > { %p2229_p10 = pnand %p2227_p9, %p2217_p8 }
  0x15   : > { %p2230_p11 = pneg %p2229_p10 }
  0x17   : > { %p2237_p2 = pnand %p2236_p0, %p2230_p11 }
  0x19   : > { %2240 = shalt.err (!%p2237_p2)
}
  0x1a   : > { %s2337_s15 = smov 256   ;;  %s2338_s16 = smov 16  }
  0x1b   : > { %2030 = dma.hbm_to_vmem [thread:$0]  (!%p2426_p7), %s2664_s1, 8192, %s218_s10, [#allocation6], %s2337_s15, %s2337_s15, %s2338_s16  }
  0x1c   : > { %s2252_s19 = scalar_lea.vmem %s234_s13, 4096  ;;  %p2260_p10 = scmp.lt.s32.totalorder %s234_s13, %s234_s13 }
  0x1d   : > { %p2253_p3 = scmp.ne.s32.totalorder %s234_s13, %s2252_s19  ;;  %p2261_p11 = scmp.lt.s32.totalorder %s2252_s19, %s2252_s19 }
  0x1f   : > { %p2255_p6 = pnand %p2253_p3, %p2217_p8  ;;  %p2262_p12 = por %p2261_p11, %p2260_p10 }
  0x21   : > { %p2256_p9 = pneg %p2255_p6 }
  0x23   : > { %p2263_p13 = pnand %p2262_p12, %p2256_p9 }
  0x25   : > { %2266 = shalt.err (!%p2263_p13)
}
  0x26   : > { %s2339_s20 = smov 64   ;;  %s2340_s21 = smov 4  }
  0x27   : > { %2033 = dma.hbm_to_vmem [thread:$0]  (!%p2426_p7), %s2666_s3, 4096, %s234_s13, [#allocation6], %s2339_s20, %s2339_s20, %s2340_s21  }
  0x28   : > { %s2452_s24 = sadd.s32 1, %s2333_s29   ;;  %s29_s26 = sadd.s32 1, %s2329_s28 }
  0x29   : > { %s26_s25 = ssub.s32 %s2333_s29, %s2452_s24  ;;  %p36_p0 = scmp.ne.s32.totalorder %s2329_s28, %s2325_s27 }
  0x2a   : > { %p27_p8 = scmp.eq.s32.totalorder %s26_s25, 0  ;;  %p37_p2 = scmp.eq.s32.totalorder %s2333_s29, 0 }
  0x2b   : > { %p2040_p6 = scmp.lt.s32.totalorder %s2333_s29, 2  ;;  %s256_s10 = sand.u32 1, %s2329_s28  }
  0x2c   : > { %s2461_s9 = scalar_select %p27_p8, %s2329_s28, %s29_s26  }
  0x2d   : > { %p38_p3 = por %p37_p2, %p36_p0  ;;  %s1859_s12 = sshll.u32 %s2333_s29, 12 }
  0x2e   : > { %s1750_s14 = sshll.u32 %s256_s10, 8  ;;  %s2469_s18 = scalar_lea.hbm %s2663_s0, %s1859_s12 }
  0x2f   : > { %s260_s13 = scalar_lea.vmem [#allocation3], %s1750_s14  ;;  %p2471_p7 = pnand %p2040_p6, %p38_p3 }
  0x30   : > { %s268_s19 = sshll.u32 %s260_s13, 4  ;;  %s2477_s21 = scalar_lea.sflag [#allocation4], %s256_s10  ;;  %s2475_s19 = int_to_ptr.vmem [resolvable:$true] %s268_s19 }
  0x31   : > { %s2267_s29 = scalar_lea.hbm %s2469_s18, 4096  ;;  %p2269_p10 = pneg %p2471_p7 }
  0x32   : > { %p2268_p9 = scmp.ne.s32.totalorder %s2469_s18, %s2267_s29  ;;  %s2272_s25 = scalar_lea.hbm %s2663_s0, 8192 }
  0x33   : > { %p2273_p13 = scmp.lt.s32.totalorder %s2469_s18, %s2663_s0  ;;  %p2274_p8 = scmp.lt.s32.totalorder %s2272_s25, %s2267_s29 }
  0x34   : > { %p2270_p11 = pnand %p2269_p10, %p2268_p9 }
  0x35   : > { %p2275_p0 = por %p2274_p8, %p2273_p13 }
  0x36   : > { %p2271_p12 = pneg %p2270_p11 }
  0x38   : > { %p2276_p2 = pnand %p2275_p0, %p2271_p12 }
  0x3a   : > { %2279 = shalt.err (!%p2276_p2)
}
  0x3b   : > { %s2280_s10 = scalar_lea.vmem %s2475_s19, 4096  ;;  %s2341_s14 = smov [#allocation3]  }
  0x3c   : > { %p2281_p3 = scmp.ne.s32.totalorder %s2475_s19, %s2280_s10  ;;  %s2285_s11 = sshll.u32 %s2341_s14, 4  ;;  %s2286_s11 = int_to_ptr.vmem [resolvable:$false] %s2285_s11 }
  0x3d   : > { %s2287_s17 = scalar_lea.vmem %s2286_s11, 8192  ;;  %p2288_p11 = scmp.lt.s32.totalorder %s2475_s19, %s2286_s11 }
  0x3e   : > { %p2283_p6 = pnand %p2281_p3, %p2269_p10  ;;  %p2289_p1 = scmp.lt.s32.totalorder %s2287_s17, %s2280_s10 }
  0x40   : > { %p2284_p9 = pneg %p2283_p6  ;;  %p2290_p4 = por %p2289_p1, %p2288_p11 }
  0x42   : > { %p2291_p5 = pnand %p2290_p4, %p2284_p9 }
  0x44   : > { %2294 = shalt.err (!%p2291_p5)
}
  0x45   : > { %2037 = dma.hbm_to_vmem [thread:$0]  (!%p2471_p7), %s2469_s18, 4096, %s2475_s19, %s2477_s21, %s2337_s15, %s2337_s15, %s2338_s16  }
  0x46   : > { %p2678_p10 = scmp.ne.s32.totalorder %s2675_s8, 0 }
  0x47   : > { %s282_s13 = sand.u32 (!%p2678_p10), 1, %s2325_s27   ;;  %p2679_p1 = scmp.ne.s32.totalorder (!%p2678_p10), %s2674_s30, 0 }
  0x48   : > { %280 = sbr.rel (%p2678_p10) target bundleno = 1001 (0x3e9), region = 48  ;;  %s1755_s29 = sshll.u32 (!%p2678_p10), %s282_s13, 8 }
  0x49   : > { %s283_s22 = scalar_lea.sflag (!%p2678_p10), [#allocation4], %s282_s13  ;;  %s2504_s23 = scalar_lea.vmem (!%p2678_p10), [#allocation3], %s1755_s29 }
  0x4d   : > { %2312 = dma.done.wait (%p2679_p1), %s283_s22, 4096  }
  0x4e   : > { %2314 = vsyncadd (%p2679_p1), %s283_s22, 4294963200  ;;  %p2680_p4 = scmp.eq.s32.totalorder %s2406_s6, 0 }
  0x50   : > { %2316 = dma.done.wait (%p2680_p4), [#allocation6], 12288   ;;  %p2681_p5 = pmov %p2680_p4 }
  0x51   : > { %v2083_v0 = vld [vmem:[#allocation5 + $0xe4] ss:$16 sps:$4 sm:$0xff]   ;;  %v2085_v1 = vld [vmem:[#allocation5 + $0xec] ss:$16 sps:$4 sm:$0xff]   ;;  %v2087_v2 = vld [vmem:[#allocation5 + $0xe0] ss:$16 sps:$4 sm:$0xff]  }
  0x52   : > { %2318 = vsyncadd (%p2681_p5), [#allocation6], 4294955008  ;;  %782 = vmatprep.subr.bf16.mxu0 %v2083_v0  ;;  %v2088_v3 = vld [vmem:[#allocation5 + $0xe8] ss:$16 sps:$4 sm:$0xff]   ;;  %895 = vmatprep.subr.bf16.mxu1 %v2085_v1  ;;  %v2089_v4 = vld [vmem:[#allocation5 + $0xc4] ss:$16 sps:$4 sm:$0xff]  }
  0x53   : > { %783 = vmatpush1.bf16.msra.mxu0 %v2087_v2  ;;  %896 = vmatpush1.bf16.msra.mxu1 %v2088_v3  ;;  %v2091_v5 = vld [vmem:[#allocation5 + $0xcc] ss:$16 sps:$4 sm:$0xff]   ;;  %v2093_v6 = vld [vmem:[#allocation5 + $0xc0] ss:$16 sps:$4 sm:$0xff]   ;;  %v2094_v7 = vld [vmem:[#allocation5 + $0xc8] ss:$16 sps:$4 sm:$0xff]  }
  0x54   : > { %784 = vmatprep.subr.bf16.mxu0 %v2089_v4  ;;  %897 = vmatprep.subr.bf16.mxu1 %v2091_v5  ;;  %v2095_v8 = vld [vmem:[#allocation5 + $0xa4] ss:$16 sps:$4 sm:$0xff]   ;;  %v2097_v9 = vld [vmem:[#allocation5 + $0xac] ss:$16 sps:$4 sm:$0xff]   ;;  %v2099_v10 = vld [vmem:[#allocation5 + $0xa0] ss:$16 sps:$4 sm:$0xff]  }
  0x55   : > { %v2100_v11 = vld [vmem:[#allocation5 + $0xa8] ss:$16 sps:$4 sm:$0xff]   ;;  %v2101_v12 = vld [vmem:[#allocation5 + $0x84] ss:$16 sps:$4 sm:$0xff]   ;;  %v2103_v13 = vld [vmem:[#allocation5 + $0x8c] ss:$16 sps:$4 sm:$0xff]  }
  0x56   : > { %v2105_v14 = vld [vmem:[#allocation5 + $0x80] ss:$16 sps:$4 sm:$0xff]   ;;  %v2106_v15 = vld [vmem:[#allocation5 + $0x88] ss:$16 sps:$4 sm:$0xff]   ;;  %v2107_v16 = vld [vmem:[#allocation5 + $0x64] ss:$16 sps:$4 sm:$0xff]  }
  0x57   : > { %785 = vmatpush1.bf16.msra.mxu0 %v2093_v6  ;;  %898 = vmatpush1.bf16.msra.mxu1 %v2094_v7  ;;  %v2109_v17 = vld [vmem:[#allocation5 + $0x6c] ss:$16 sps:$4 sm:$0xff]   ;;  %v2111_v18 = vld [vmem:[#allocation5 + $0x60] ss:$16 sps:$4 sm:$0xff]   ;;  %v2112_v19 = vld [vmem:[#allocation5 + $0x68] ss:$16 sps:$4 sm:$0xff]  }
  0x58   : > { %786 = vmatprep.subr.bf16.mxu0 %v2095_v8  ;;  %899 = vmatprep.subr.bf16.mxu1 %v2097_v9  ;;  %v2113_v20 = vld [vmem:[#allocation5 + $0x44] ss:$16 sps:$4 sm:$0xff]   ;;  %v2115_v21 = vld [vmem:[#allocation5 + $0x4c] ss:$16 sps:$4 sm:$0xff]   ;;  %v2117_v22 = vld [vmem:[#allocation5 + $0x40] ss:$16 sps:$4 sm:$0xff]  }
  0x59   : > { %v2118_v23 = vld [vmem:[#allocation5 + $0x48] ss:$16 sps:$4 sm:$0xff]   ;;  %v2119_v24 = vld [vmem:[#allocation5 + $0x24] ss:$16 sps:$4 sm:$0xff]   ;;  %v2121_v25 = vld [vmem:[#allocation5 + $0x2c] ss:$16 sps:$4 sm:$0xff]  }
  0x5a   : > { %v2123_v26 = vld [vmem:[#allocation5 + $0x20] ss:$16 sps:$4 sm:$0xff]   ;;  %v2124_v27 = vld [vmem:[#allocation5 + $0x28] ss:$16 sps:$4 sm:$0xff]   ;;  %v2125_v28 = vld [vmem:[#allocation5 + $0x4] ss:$16 sps:$4 sm:$0xff]  }
  0x5b   : > { %787 = vmatpush1.bf16.msra.mxu0 %v2099_v10  ;;  %900 = vmatpush1.bf16.msra.mxu1 %v2100_v11  ;;  %v2127_v29 = vld [vmem:[#allocation5 + $0xc] ss:$16 sps:$4 sm:$0xff]   ;;  %v2129_v30 = vld [vmem:[#allocation5] ss:$16 sps:$4 sm:$0xff]   ;;  %v2130_v31 = vld [vmem:[#allocation5 + $0x8] ss:$16 sps:$4 sm:$0xff]  }
  0x5c   : > { %788 = vmatprep.subr.bf16.mxu0 %v2101_v12  ;;  %901 = vmatprep.subr.bf16.mxu1 %v2103_v13  ;;  %v2131_v32 = vld [vmem:[#allocation5 + $0x1e4] ss:$16 sps:$4 sm:$0xff]   ;;  %v2133_v33 = vld [vmem:[#allocation5 + $0x1ec] ss:$16 sps:$4 sm:$0xff]   ;;  %v2135_v34 = vld [vmem:[#allocation5 + $0x1e0] ss:$16 sps:$4 sm:$0xff]  }
  0x5d   : > { %v2136_v35 = vld [vmem:[#allocation5 + $0x1e8] ss:$16 sps:$4 sm:$0xff]   ;;  %v2137_v36 = vld [vmem:[#allocation5 + $0x1c4] ss:$16 sps:$4 sm:$0xff]   ;;  %v2139_v37 = vld [vmem:[#allocation5 + $0x1cc] ss:$16 sps:$4 sm:$0xff]  }
  0x5e   : > { %v2141_v38 = vld [vmem:[#allocation5 + $0x1c0] ss:$16 sps:$4 sm:$0xff]   ;;  %v2142_v39 = vld [vmem:[#allocation5 + $0x1c8] ss:$16 sps:$4 sm:$0xff]   ;;  %v2143_v40 = vld [vmem:[#allocation5 + $0x1a4] ss:$16 sps:$4 sm:$0xff]  }
  0x5f   : > { %789 = vmatpush1.bf16.msra.mxu0 %v2105_v14  ;;  %902 = vmatpush1.bf16.msra.mxu1 %v2106_v15  ;;  %v2145_v41 = vld [vmem:[#allocation5 + $0x1ac] ss:$16 sps:$4 sm:$0xff]   ;;  %v2147_v42 = vld [vmem:[#allocation5 + $0x1a0] ss:$16 sps:$4 sm:$0xff]   ;;  %v2148_v43 = vld [vmem:[#allocation5 + $0x1a8] ss:$16 sps:$4 sm:$0xff]  }
  0x60   : > { %790 = vmatprep.subr.bf16.mxu0 %v2107_v16  ;;  %903 = vmatprep.subr.bf16.mxu1 %v2109_v17  ;;  %v2149_v44 = vld [vmem:[#allocation5 + $0x184] ss:$16 sps:$4 sm:$0xff]   ;;  %v2151_v45 = vld [vmem:[#allocation5 + $0x18c] ss:$16 sps:$4 sm:$0xff]   ;;  %v2153_v48 = vld [vmem:[#allocation5 + $0x180] ss:$16 sps:$4 sm:$0xff]  }
  0x61   : > { %v329_v46 = vld [vmem:[%s2504_s23 + $0x8] sm:$0xff]  ;;  %v331_v47 = vld [vmem:[%s2504_s23 + $0x18] sm:$0xff]  ;;  %v2155_v51 = vld [vmem:[#allocation5 + $0x164] ss:$16 sps:$4 sm:$0xff]   ;;  %vm2343_vm0 = vmmov 0   ;;  %s1618_s20 = sld [smem:[#allocation2]] }
  0x62   : > { %v2154_v49 = vld [vmem:[#allocation5 + $0x188] ss:$16 sps:$4 sm:$0xff]   ;;  %v361_v50 = vpack.c.bf16 %v331_v47, %v329_v46  ;;  %v2157_v52 = vld [vmem:[#allocation5 + $0x16c] ss:$16 sps:$4 sm:$0xff]   ;;  %v2159_v53 = vld [vmem:[#allocation5 + $0x160] ss:$16 sps:$4 sm:$0xff]  }
  0x63   : > { %791 = vmatpush1.bf16.msra.mxu0 %v2111_v18  ;;  %904 = vmatpush1.bf16.msra.mxu1 %v2112_v19  ;;  %v2160_v54 = vld [vmem:[#allocation5 + $0x168] ss:$16 sps:$4 sm:$0xff]   ;;  %v2161_v55 = vld [vmem:[#allocation5 + $0x144] ss:$16 sps:$4 sm:$0xff]   ;;  %v2163_v56 = vld [vmem:[#allocation5 + $0x14c] ss:$16 sps:$4 sm:$0xff]  }
  0x64   : > { %792 = vmatprep.subr.bf16.mxu0 %v2113_v20  ;;  %905 = vmatprep.subr.bf16.mxu1 %v2115_v21  ;;  %v2165_v57 = vld [vmem:[#allocation5 + $0x140] ss:$16 sps:$4 sm:$0xff]   ;;  %v2166_v58 = vld [vmem:[#allocation5 + $0x148] ss:$16 sps:$4 sm:$0xff]   ;;  %v2167_v59 = vld [vmem:[#allocation5 + $0x124] ss:$16 sps:$4 sm:$0xff]  }
  0x65   : > { %814 = vmatprep.mubr.bf16.mxu0 %v361_v50  ;;  %927 = vmatprep.mubr.bf16.mxu1 %v361_v50  ;;  %v2169_v60 = vld [vmem:[#allocation5 + $0x12c] ss:$16 sps:$4 sm:$0xff]   ;;  %v2171_v61 = vld [vmem:[#allocation5 + $0x120] ss:$16 sps:$4 sm:$0xff]   ;;  %v2172_v62 = vld [vmem:[#allocation5 + $0x128] ss:$16 sps:$4 sm:$0xff]  }
  0x66   : > { %v2173_v63 = vld [vmem:[#allocation5 + $0x104] ss:$16 sps:$4 sm:$0xff]   ;;  %v2175_v0 = vld [vmem:[#allocation5 + $0x10c] ss:$16 sps:$4 sm:$0xff]   ;;  %v2177_v1 = vld [vmem:[#allocation5 + $0x100] ss:$16 sps:$4 sm:$0xff]  }
  0x67   : > { %793 = vmatpush1.bf16.msra.mxu0 %v2117_v22  ;;  %906 = vmatpush1.bf16.msra.mxu1 %v2118_v23  ;;  %v2178_v2 = vld [vmem:[#allocation5 + $0x108] ss:$16 sps:$4 sm:$0xff]   ;;  %v328_v3 = vld [vmem:[%s2504_s23] sm:$0xff]  ;;  %v330_v4 = vld [vmem:[%s2504_s23 + $0x10] sm:$0xff]  ;;  %p324_p7 = scmp.lt.s32.totalorder %s2406_s6, 1 }
  0x68   : > { %794 = vmatprep.subr.bf16.mxu0 %v2119_v24  ;;  %907 = vmatprep.subr.bf16.mxu1 %v2121_v25  ;;  %v333_v5 = vld [vmem:[%s2504_s23 + $0x28] sm:$0xff]  ;;  %v335_v6 = vld [vmem:[%s2504_s23 + $0x38] sm:$0xff]  ;;  %v360_v9 = vpack.c.bf16 %v330_v4, %v328_v3  ;;  %v2183_v13 = vld [vmem:[#allocation7 + $0x70] sm:$0xff]  }
  0x69   : > { %v2179_v7 = vld [vmem:[#allocation7 + $0x78] sm:$0xff]   ;;  %v363_v11 = vpack.c.bf16 %v335_v6, %v333_v5  ;;  %v332_v14 = vld [vmem:[%s2504_s23 + $0x20] sm:$0xff]  ;;  %v334_v15 = vld [vmem:[%s2504_s23 + $0x30] sm:$0xff]  ;;  %s2687_s6 = smov (!%p324_p7, %s2406_s6), 1 }
  0x6a   : > { %v2180_v8 = vld [vmem:[#allocation7 + $0xf8] sm:$0xff]   ;;  %v2184_v16 = vld [vmem:[#allocation7 + $0xf0] sm:$0xff]   ;;  %v337_v17 = vld [vmem:[%s2504_s23 + $0x48] sm:$0xff]  ;;  %v362_v23 = vpack.c.bf16 %v334_v15, %v332_v14  ;;  %s326_s26 = scalar_lea.vmem %s2670_s7, %s2687_s6 }
  0x6b   : > { %795 = vmatpush1.bf16.msra.mxu0 %v2123_v26  ;;  %908 = vmatpush1.bf16.msra.mxu1 %v2124_v27  ;;  %v2181_v10 = vld [vmem:[#allocation7 + $0x38] sm:$0xff]   ;;  %v2185_v19 = vld [vmem:[#allocation7 + $0x30] sm:$0xff]   ;;  %v2187_v21 = vld [vmem:[#allocation7 + $0x68] sm:$0xff]  }
  0x6c   : > { %796 = vmatprep.subr.bf16.mxu0 %v2125_v28  ;;  %909 = vmatprep.subr.bf16.mxu1 %v2127_v29  ;;  %v2182_v12 = vld [vmem:[#allocation7 + $0xb8] sm:$0xff]   ;;  %v2186_v20 = vld [vmem:[#allocation7 + $0xb0] sm:$0xff]   ;;  %v2188_v22 = vld [vmem:[#allocation7 + $0xe8] sm:$0xff]  }
  0x6d   : > { %v339_v18 = vld [vmem:[%s2504_s23 + $0x58] sm:$0xff]  ;;  %v2189_v24 = vld [vmem:[#allocation7 + $0x28] sm:$0xff]   ;;  %v2191_v27 = vld [vmem:[#allocation7 + $0x60] sm:$0xff]  }
  0x6e   : > { %v365_v25 = vpack.c.bf16 %v339_v18, %v337_v17  ;;  %v2190_v26 = vld [vmem:[#allocation7 + $0xa8] sm:$0xff]   ;;  %v2192_v28 = vld [vmem:[#allocation7 + $0xe0] sm:$0xff]   ;;  %v351_v50 = vld [vmem:[%s2504_s23 + $0xb8] sm:$0xff] }
  0x6f   : > { %797 = vmatpush1.bf16.msra.mxu0 %v2129_v30  ;;  %910 = vmatpush1.bf16.msra.mxu1 %v2130_v31  ;;  %v336_v29 = vld [vmem:[%s2504_s23 + $0x40] sm:$0xff]  ;;  %v338_v30 = vld [vmem:[%s2504_s23 + $0x50] sm:$0xff]  ;;  %v341_v31 = vld [vmem:[%s2504_s23 + $0x68] sm:$0xff] }
  0x70   : > { %798 = vmatprep.subr.bf16.mxu0 %v2131_v32  ;;  %911 = vmatprep.subr.bf16.mxu1 %v2133_v33  ;;  %v343_v32 = vld [vmem:[%s2504_s23 + $0x78] sm:$0xff]  ;;  %v2193_v33 = vld [vmem:[#allocation7 + $0x20] sm:$0xff]   ;;  %v2199_v4 = vld [vmem:[#allocation7 + $0x50] sm:$0xff]  }
  0x71   : > { %v344_v47 = vld [vmem:[%s2504_s23 + $0x80] sm:$0xff]  ;;  %v2200_v5 = vld [vmem:[#allocation7 + $0xd0] sm:$0xff]  }
  0x72   : > { %v2201_v6 = vld [vmem:[#allocation7 + $0x10] sm:$0xff]   ;;  %v2209_v14 = vld [vmem:[#allocation7] sm:$0xff]  }
  0x73   : > { %799 = vmatpush2.bf16.msra.mxu0 %v2135_v34  ;;  %912 = vmatpush2.bf16.msra.mxu1 %v2136_v35  ;;  %v2194_v34 = vld [vmem:[#allocation7 + $0xa0] sm:$0xff]   ;;  %v2195_v35 = vld [vmem:[#allocation7 + $0x58] sm:$0xff]  }
  0x74   : > { %800 = vmatprep.subr.bf16.mxu0 %v2137_v36  ;;  %913 = vmatprep.subr.bf16.mxu1 %v2139_v37  ;;  %v2196_v36 = vld [vmem:[#allocation7 + $0xd8] sm:$0xff]   ;;  %v364_v37 = vpack.c.bf16 %v338_v30, %v336_v29  ;;  %v2210_v15 = vld [vmem:[#allocation7 + $0x80] sm:$0xff]  }
  0x77   : > { %801 = vmatpush2.bf16.msra.mxu0 %v2141_v38  ;;  %914 = vmatpush2.bf16.msra.mxu1 %v2142_v39  ;;  %v2197_v38 = vld [vmem:[#allocation7 + $0x18] sm:$0xff]   ;;  %v367_v39 = vpack.c.bf16 %v343_v32, %v341_v31 }
  0x78   : > { %802 = vmatprep.subr.bf16.mxu0 %v2143_v40  ;;  %915 = vmatprep.subr.bf16.mxu1 %v2145_v41  ;;  %v2198_v40 = vld [vmem:[#allocation7 + $0x98] sm:$0xff]   ;;  %v340_v41 = vld [vmem:[%s2504_s23 + $0x60] sm:$0xff] }
  0x7b   : > { %803 = vmatpush2.bf16.msra.mxu0 %v2147_v42  ;;  %916 = vmatpush2.bf16.msra.mxu1 %v2148_v43  ;;  %v342_v42 = vld [vmem:[%s2504_s23 + $0x70] sm:$0xff]  ;;  %v345_v43 = vld [vmem:[%s2504_s23 + $0x88] sm:$0xff] }
  0x7c   : > { %804 = vmatprep.subr.bf16.mxu0 %v2149_v44  ;;  %917 = vmatprep.subr.bf16.mxu1 %v2151_v45  ;;  %v347_v44 = vld [vmem:[%s2504_s23 + $0x98] sm:$0xff]  ;;  %v366_v45 = vpack.c.bf16 %v342_v42, %v340_v41 }
  0x7d   : > { %v369_v46 = vpack.c.bf16 %v347_v44, %v345_v43 }
  0x7f   : > { %805 = vmatpush2.bf16.msra.mxu0 %v2153_v48  ;;  %918 = vmatpush2.bf16.msra.mxu1 %v2154_v49  ;;  %v346_v48 = vld [vmem:[%s2504_s23 + $0x90] sm:$0xff]  ;;  %v349_v49 = vld [vmem:[%s2504_s23 + $0xa8] sm:$0xff] }
  0x80   : > { %806 = vmatprep.subr.bf16.mxu0 %v2155_v51  ;;  %919 = vmatprep.subr.bf16.mxu1 %v2157_v52  ;;  %v368_v51 = vpack.c.bf16 %v346_v48, %v344_v47  ;;  %v371_v52 = vpack.c.bf16 %v351_v50, %v349_v49 }
  0x83   : > { %807 = vmatpush2.bf16.msra.mxu0 %v2159_v53  ;;  %920 = vmatpush2.bf16.msra.mxu1 %v2160_v54  ;;  %v348_v53 = vld [vmem:[%s2504_s23 + $0xa0] sm:$0xff]  ;;  %v350_v54 = vld [vmem:[%s2504_s23 + $0xb0] sm:$0xff] }
  0x84   : > { %808 = vmatprep.subr.bf16.mxu0 %v2161_v55  ;;  %921 = vmatprep.subr.bf16.mxu1 %v2163_v56  ;;  %v353_v55 = vld [vmem:[%s2504_s23 + $0xc8] sm:$0xff]  ;;  %v355_v56 = vld [vmem:[%s2504_s23 + $0xd8] sm:$0xff] }
  0x87   : > { %809 = vmatpush2.bf16.msra.mxu0 %v2165_v57  ;;  %922 = vmatpush2.bf16.msra.mxu1 %v2166_v58  ;;  %v370_v57 = vpack.c.bf16 %v350_v54, %v348_v53  ;;  %v373_v58 = vpack.c.bf16 %v355_v56, %v353_v55 }
  0x88   : > { %810 = vmatprep.subr.bf16.mxu0 %v2167_v59  ;;  %923 = vmatprep.subr.bf16.mxu1 %v2169_v60  ;;  %v352_v59 = vld [vmem:[%s2504_s23 + $0xc0] sm:$0xff]  ;;  %v354_v60 = vld [vmem:[%s2504_s23 + $0xd0] sm:$0xff] }
  0x8b   : > { %811 = vmatpush2.bf16.msra.mxu0 %v2171_v61  ;;  %924 = vmatpush2.bf16.msra.mxu1 %v2172_v62  ;;  %v357_v61 = vld [vmem:[%s2504_s23 + $0xe8] sm:$0xff]  ;;  %v359_v62 = vld [vmem:[%s2504_s23 + $0xf8] sm:$0xff] }
  0x8c   : > { %812 = vmatprep.subr.bf16.mxu0 %v2173_v63  ;;  %925 = vmatprep.subr.bf16.mxu1 %v2175_v0  ;;  %v372_v63 = vpack.c.bf16 %v354_v60, %v352_v59  ;;  %v375_v0 = vpack.c.bf16 %v359_v62, %v357_v61 }
  0x8f   : > { %813 = vmatpush2.bf16.msra.mxu0 %v2177_v1  ;;  %926 = vmatpush2.bf16.msra.mxu1 %v2178_v2  ;;  %v356_v1 = vld [vmem:[%s2504_s23 + $0xe0] sm:$0xff]  ;;  %v358_v2 = vld [vmem:[%s2504_s23 + $0xf0] sm:$0xff] }
  0x90   : > { %1860 = vmatprep.subr.bf16.mxu0 %v2179_v7  ;;  %1924 = vmatprep.subr.bf16.mxu1 %v2180_v8  ;;  %v374_v3 = vpack.c.bf16 %v358_v2, %v356_v1  ;;  %v2202_v7 = vld [vmem:[#allocation7 + $0x90] sm:$0xff]   ;;  %v2203_v8 = vld [vmem:[#allocation7 + $0x48] sm:$0xff]  }
  0x92   : > { %815 = vmatmul.mubr.bf16.vlgmr.msra.gmra.mxu0 %v360_v9  ;;  %928 = vmatmul.mubr.bf16.vlgmr.msra.gmra.mxu1 %v360_v9  ;;  %v2204_v9 = vld [vmem:[#allocation7 + $0xc8] sm:$0xff]  }
  0x93   : > { %824 = vmatprep.mubr.bf16.mxu0 %v363_v11  ;;  %937 = vmatprep.mubr.bf16.mxu1 %v363_v11  ;;  %v2206_v11 = vld [vmem:[#allocation7 + $0x88] sm:$0xff]  }
  0x94   : > { %1861 = vmatpush3.bf16.msra.mxu0 %v2181_v10  ;;  %1925 = vmatpush3.bf16.msra.mxu1 %v2182_v12  ;;  %v2205_v10 = vld [vmem:[#allocation7 + $0x8] sm:$0xff]   ;;  %v2207_v12 = vld [vmem:[#allocation7 + $0x40] sm:$0xff]  }
  0x95   : > { %1862 = vmatprep.subr.bf16.mxu0 %v2183_v13  ;;  %1926 = vmatprep.subr.bf16.mxu1 %v2184_v16  ;;  %v2208_v13 = vld [vmem:[#allocation7 + $0xc0] sm:$0xff]   ;;  %v442_v16 = vlaneseq }
  0x97   : > { %v443_v17 = vshrl.u32 %v442_v16, 7 }
  0x98   : > { %1863 = vmatpush3.bf16.msra.mxu0 %v2185_v19  ;;  %1927 = vmatpush3.bf16.msra.mxu1 %v2186_v20 }
  0x99   : > { %1864 = vmatprep.subr.bf16.mxu0 %v2187_v21  ;;  %1928 = vmatprep.subr.bf16.mxu1 %v2188_v22  ;;  %v448_v18 = vsub.s32 1, %v443_v17  ;;  %v456_v19 = vsub.s32 3, %v443_v17  ;;  %v444_v20 = vsub.s32 0, %v443_v17  ;;  %v452_v21 = vsub.s32 2, %v443_v17  ;;  %v440_v22 = vld [vmem:[%s2665_s2] sm:$0xf] }
  0x9a   : > { %825 = vmatmul.mubr.bf16.gmra.mxu0 %v362_v23  ;;  %938 = vmatmul.mubr.bf16.gmra.mxu1 %v362_v23 }
  0x9b   : > { %834 = vmatprep.mubr.bf16.mxu0 %v365_v25  ;;  %947 = vmatprep.mubr.bf16.mxu1 %v365_v25  ;;  %v2549_v25 = vrot.slane %v440_v22, %v448_v18 }
  0x9c   : > { %1865 = vmatpush3.bf16.msra.mxu0 %v2189_v24  ;;  %1929 = vmatpush3.bf16.msra.mxu1 %v2190_v26  ;;  %v2551_v26 = vrot.slane %v440_v22, %v456_v19 }
  0x9d   : > { %1866 = vmatprep.subr.bf16.mxu0 %v2191_v27  ;;  %1930 = vmatprep.subr.bf16.mxu1 %v2192_v28  ;;  %v2553_v27 = vrot.slane %v440_v22, %v444_v20  ;;  %v2555_v28 = vrot.slane %v440_v22, %v452_v21 }
  0xa0   : > { %1867 = vmatpush3.bf16.msra.mxu0 %v2193_v33  ;;  %1931 = vmatpush3.bf16.msra.mxu1 %v2194_v34 }
  0xa1   : > { %1868 = vmatprep.subr.bf16.mxu0 %v2195_v35  ;;  %1932 = vmatprep.subr.bf16.mxu1 %v2196_v36 }
  0xa2   : > { %835 = vmatmul.mubr.bf16.gmra.mxu0 %v364_v37  ;;  %948 = vmatmul.mubr.bf16.gmra.mxu1 %v364_v37 }
  0xa3   : > { %844 = vmatprep.mubr.bf16.mxu0 %v367_v39  ;;  %957 = vmatprep.mubr.bf16.mxu1 %v367_v39 }
  0xa4   : > { %1869 = vmatpush3.bf16.msra.mxu0 %v2197_v38  ;;  %1933 = vmatpush3.bf16.msra.mxu1 %v2198_v40 }
  0xa5   : > { %1870 = vmatprep.subr.bf16.mxu0 %v2199_v4  ;;  %1934 = vmatprep.subr.bf16.mxu1 %v2200_v5 }
  0xa8   : > { %1871 = vmatpush3.bf16.msra.mxu0 %v2201_v6  ;;  %1935 = vmatpush3.bf16.msra.mxu1 %v2202_v7 }
  0xa9   : > { %1872 = vmatprep.subr.bf16.mxu0 %v2203_v8  ;;  %1936 = vmatprep.subr.bf16.mxu1 %v2204_v9 }
  0xaa   : > { %845 = vmatmul.mubr.bf16.gmra.mxu0 %v366_v45  ;;  %958 = vmatmul.mubr.bf16.gmra.mxu1 %v366_v45 }
  0xab   : > { %854 = vmatprep.mubr.bf16.mxu0 %v369_v46  ;;  %967 = vmatprep.mubr.bf16.mxu1 %v369_v46 }
  0xac   : > { %1873 = vmatpush3.bf16.msra.mxu0 %v2205_v10  ;;  %1937 = vmatpush3.bf16.msra.mxu1 %v2206_v11 }
  0xad   : > { %1874 = vmatprep.subr.bf16.mxu0 %v2207_v12  ;;  %1938 = vmatprep.subr.bf16.mxu1 %v2208_v13 }
  0xb0   : > { %1875 = vmatpush3.bf16.msra.mxu0 %v2209_v14  ;;  %1939 = vmatpush3.bf16.msra.mxu1 %v2210_v15 }
  0xb2   : > { %855 = vmatmul.mubr.bf16.gmra.mxu0 %v368_v51  ;;  %968 = vmatmul.mubr.bf16.gmra.mxu1 %v368_v51 }
  0xb3   : > { %864 = vmatprep.mubr.bf16.mxu0 %v371_v52  ;;  %977 = vmatprep.mubr.bf16.mxu1 %v371_v52 }
  0xba   : > { %865 = vmatmul.mubr.bf16.gmra.mxu0 %v370_v57  ;;  %978 = vmatmul.mubr.bf16.gmra.mxu1 %v370_v57 }
  0xbb   : > { %874 = vmatprep.mubr.bf16.mxu0 %v373_v58  ;;  %987 = vmatprep.mubr.bf16.mxu1 %v373_v58 }
  0xc2   : > { %875 = vmatmul.mubr.bf16.gmra.mxu0 %v372_v63  ;;  %988 = vmatmul.mubr.bf16.gmra.mxu1 %v372_v63 }
  0xc3   : > { %884 = vmatprep.mubr.bf16.mxu0 %v375_v0  ;;  %997 = vmatprep.mubr.bf16.mxu1 %v375_v0 }
  0xca   : > { %885 = vmatmul.mubr.bf16.gmra.mxu0 %v374_v3  ;;  %998 = vmatmul.mubr.bf16.gmra.mxu1 %v374_v3 }
 0x152   : > { %v816_v23 = vpop.f32.mrf.mxu0  ;;  %v929_v24 = vpop.f32.mrf.mxu1 }
 0x153   : > { %v817_v37 = vadd.f32 %v816_v23, %v2553_v27  ;;  %v930_v38 = vadd.f32 %v929_v24, %v2555_v28 }
 0x154   : > { %v818_v29 = vpop.f32.mrf.mxu0  ;;  %v931_v30 = vpop.f32.mrf.mxu1 }
 0x155   : > { %v819_v33 = vadd.f32 %v818_v29, %v2549_v25  ;;  %v932_v34 = vadd.f32 %v931_v30, %v2551_v26  ;;  %v1008_v51 = vmax.f32 %v817_v37, 0.0  ;;  %v1010_v52 = vmax.f32 %v930_v38, 0.0 }
 0x156   : > { %v820_v31 = vpop.f32.mrf.mxu0  ;;  %v933_v32 = vpop.f32.mrf.mxu1 }
 0x157   : > { %v821_v35 = vadd.f32 %v820_v31, %v2553_v27  ;;  %v934_v36 = vadd.f32 %v933_v32, %v2555_v28  ;;  %v1009_v47 = vmax.f32 %v819_v33, 0.0  ;;  %v1011_v48 = vmax.f32 %v932_v34, 0.0 }
 0x158   : > { %v822_v39 = vpop.f32.mrf.mxu0  ;;  %v935_v40 = vpop.f32.mrf.mxu1 }
 0x159   : > { %v823_v41 = vadd.f32 %v822_v39, %v2549_v25  ;;  %v936_v42 = vadd.f32 %v935_v40, %v2551_v26  ;;  %v1012_v43 = vmax.f32 %v821_v35, 0.0  ;;  %v1014_v44 = vmax.f32 %v934_v36, 0.0 }
 0x15a   : > { %v826_v45 = vpop.f32.mrf.mxu0  ;;  %v939_v46 = vpop.f32.mrf.mxu1 }
 0x15b   : > { %v1013_v49 = vmax.f32 %v823_v41, 0.0  ;;  %v1015_v50 = vmax.f32 %v936_v42, 0.0  ;;  %v1072_v57 = vpack.c.bf16 %v1012_v43, %v1008_v51  ;;  %v1074_v58 = vpack.c.bf16 %v1014_v44, %v1010_v52 }
 0x15c   : > { %v828_v53 = vpop.f32.mrf.mxu0  ;;  %v941_v54 = vpop.f32.mrf.mxu1  ;;  %v827_v1 = vadd.f32 %v826_v45, %v2553_v27  ;;  %v940_v2 = vadd.f32 %v939_v46, %v2555_v28 }
 0x15d   : > { %v1073_v55 = vpack.c.bf16 %v1013_v49, %v1009_v47  ;;  %v1075_v56 = vpack.c.bf16 %v1015_v50, %v1011_v48  ;;  %v829_v59 = vadd.f32 %v828_v53, %v2549_v25  ;;  %v942_v62 = vadd.f32 %v941_v54, %v2551_v26 }
 0x15e   : > { %v830_v60 = vpop.f32.mrf.mxu0  ;;  %v943_v61 = vpop.f32.mrf.mxu1  ;;  %v1016_v15 = vmax.f32 %v827_v1, 0.0  ;;  %v1018_v16 = vmax.f32 %v940_v2, 0.0 }
 0x15f   : > { %v831_v63 = vadd.f32 %v830_v60, %v2553_v27  ;;  %v944_v0 = vadd.f32 %v943_v61, %v2555_v28  ;;  %1399 = vmatprep.mubr.bf16.mxu0 %v1073_v55  ;;  %1496 = vmatprep.mubr.bf16.mxu1 %v1075_v56  ;;  %v1017_v11 = vmax.f32 %v829_v59, 0.0  ;;  %v1019_v12 = vmax.f32 %v942_v62, 0.0 }
 0x160   : > { %v832_v3 = vpop.f32.mrf.mxu0  ;;  %v945_v4 = vpop.f32.mrf.mxu1  ;;  %1400 = vmatmul.mubr.bf16.vlgmr.msra.gmra.mxu0 %v1072_v57  ;;  %1497 = vmatmul.mubr.bf16.vlgmr.msra.gmra.mxu1 %v1074_v58 }
 0x161   : > { %v833_v5 = vadd.f32 %v832_v3, %v2549_v25  ;;  %v946_v6 = vadd.f32 %v945_v4, %v2551_v26  ;;  %v1020_v7 = vmax.f32 %v831_v63, 0.0  ;;  %v1022_v8 = vmax.f32 %v944_v0, 0.0 }
 0x162   : > { %v836_v9 = vpop.f32.mrf.mxu0  ;;  %v949_v10 = vpop.f32.mrf.mxu1 }
 0x163   : > { %v1021_v13 = vmax.f32 %v833_v5, 0.0  ;;  %v1023_v14 = vmax.f32 %v946_v6, 0.0  ;;  %v1076_v21 = vpack.c.bf16 %v1020_v7, %v1016_v15  ;;  %v1078_v22 = vpack.c.bf16 %v1022_v8, %v1018_v16 }
 0x164   : > { %v838_v17 = vpop.f32.mrf.mxu0  ;;  %v951_v18 = vpop.f32.mrf.mxu1  ;;  %v837_v33 = vadd.f32 %v836_v9, %v2553_v27  ;;  %v950_v34 = vadd.f32 %v949_v10, %v2555_v28 }
 0x165   : > { %v1077_v19 = vpack.c.bf16 %v1021_v13, %v1017_v11  ;;  %v1079_v20 = vpack.c.bf16 %v1023_v14, %v1019_v12  ;;  %v839_v23 = vadd.f32 %v838_v17, %v2549_v25  ;;  %v952_v30 = vadd.f32 %v951_v18, %v2551_v26 }
 0x166   : > { %v840_v24 = vpop.f32.mrf.mxu0  ;;  %v953_v29 = vpop.f32.mrf.mxu1  ;;  %v1024_v47 = vmax.f32 %v837_v33, 0.0  ;;  %v1026_v48 = vmax.f32 %v950_v34, 0.0 }
 0x167   : > { %v841_v31 = vadd.f32 %v840_v24, %v2553_v27  ;;  %v954_v32 = vadd.f32 %v953_v29, %v2555_v28  ;;  %1407 = vmatprep.mubr.bf16.mxu0 %v1077_v19  ;;  %1504 = vmatprep.mubr.bf16.mxu1 %v1079_v20  ;;  %v1025_v43 = vmax.f32 %v839_v23, 0.0  ;;  %v1027_v44 = vmax.f32 %v952_v30, 0.0 }
 0x168   : > { %v842_v35 = vpop.f32.mrf.mxu0  ;;  %v955_v36 = vpop.f32.mrf.mxu1  ;;  %1408 = vmatmul.mubr.bf16.gmra.mxu0 %v1076_v21  ;;  %1505 = vmatmul.mubr.bf16.gmra.mxu1 %v1078_v22 }
 0x169   : > { %v843_v37 = vadd.f32 %v842_v35, %v2549_v25  ;;  %v956_v38 = vadd.f32 %v955_v36, %v2551_v26  ;;  %v1028_v39 = vmax.f32 %v841_v31, 0.0  ;;  %v1030_v40 = vmax.f32 %v954_v32, 0.0 }
 0x16a   : > { %v846_v41 = vpop.f32.mrf.mxu0  ;;  %v959_v42 = vpop.f32.mrf.mxu1 }
 0x16b   : > { %v1029_v45 = vmax.f32 %v843_v37, 0.0  ;;  %v1031_v46 = vmax.f32 %v956_v38, 0.0  ;;  %v1080_v53 = vpack.c.bf16 %v1028_v39, %v1024_v47  ;;  %v1082_v54 = vpack.c.bf16 %v1030_v40, %v1026_v48 }
 0x16c   : > { %v848_v49 = vpop.f32.mrf.mxu0  ;;  %v961_v50 = vpop.f32.mrf.mxu1  ;;  %v847_v61 = vadd.f32 %v846_v41, %v2553_v27  ;;  %v960_v62 = vadd.f32 %v959_v42, %v2555_v28 }
 0x16d   : > { %v1081_v51 = vpack.c.bf16 %v1029_v45, %v1025_v43  ;;  %v1083_v52 = vpack.c.bf16 %v1031_v46, %v1027_v44  ;;  %v849_v55 = vadd.f32 %v848_v49, %v2549_v25  ;;  %v962_v58 = vadd.f32 %v961_v50, %v2551_v26 }
 0x16e   : > { %v850_v56 = vpop.f32.mrf.mxu0  ;;  %v963_v57 = vpop.f32.mrf.mxu1  ;;  %v1032_v11 = vmax.f32 %v847_v61, 0.0  ;;  %v1034_v12 = vmax.f32 %v960_v62, 0.0 }
 0x16f   : > { %v851_v59 = vadd.f32 %v850_v56, %v2553_v27  ;;  %v964_v60 = vadd.f32 %v963_v57, %v2555_v28  ;;  %1415 = vmatprep.mubr.bf16.mxu0 %v1081_v51  ;;  %1512 = vmatprep.mubr.bf16.mxu1 %v1083_v52  ;;  %v1033_v7 = vmax.f32 %v849_v55, 0.0  ;;  %v1035_v8 = vmax.f32 %v962_v58, 0.0 }
 0x170   : > { %v852_v63 = vpop.f32.mrf.mxu0  ;;  %v965_v0 = vpop.f32.mrf.mxu1  ;;  %1416 = vmatmul.mubr.bf16.gmra.mxu0 %v1080_v53  ;;  %1513 = vmatmul.mubr.bf16.gmra.mxu1 %v1082_v54 }
 0x171   : > { %v853_v1 = vadd.f32 %v852_v63, %v2549_v25  ;;  %v966_v2 = vadd.f32 %v965_v0, %v2551_v26  ;;  %v1036_v3 = vmax.f32 %v851_v59, 0.0  ;;  %v1038_v4 = vmax.f32 %v964_v60, 0.0 }
 0x172   : > { %v856_v5 = vpop.f32.mrf.mxu0  ;;  %v969_v6 = vpop.f32.mrf.mxu1 }
 0x173   : > { %v1037_v9 = vmax.f32 %v853_v1, 0.0  ;;  %v1039_v10 = vmax.f32 %v966_v2, 0.0  ;;  %v1084_v17 = vpack.c.bf16 %v1036_v3, %v1032_v11  ;;  %v1086_v18 = vpack.c.bf16 %v1038_v4, %v1034_v12 }
 0x174   : > { %v858_v13 = vpop.f32.mrf.mxu0  ;;  %v971_v14 = vpop.f32.mrf.mxu1  ;;  %v857_v29 = vadd.f32 %v856_v5, %v2553_v27  ;;  %v970_v30 = vadd.f32 %v969_v6, %v2555_v28 }
 0x175   : > { %v1085_v15 = vpack.c.bf16 %v1037_v9, %v1033_v7  ;;  %v1087_v16 = vpack.c.bf16 %v1039_v10, %v1035_v8  ;;  %v859_v19 = vadd.f32 %v858_v13, %v2549_v25  ;;  %v972_v22 = vadd.f32 %v971_v14, %v2551_v26 }
 0x176   : > { %v860_v20 = vpop.f32.mrf.mxu0  ;;  %v973_v21 = vpop.f32.mrf.mxu1  ;;  %v1040_v43 = vmax.f32 %v857_v29, 0.0  ;;  %v1042_v44 = vmax.f32 %v970_v30, 0.0 }
 0x177   : > { %v861_v23 = vadd.f32 %v860_v20, %v2553_v27  ;;  %v974_v24 = vadd.f32 %v973_v21, %v2555_v28  ;;  %1423 = vmatprep.mubr.bf16.mxu0 %v1085_v15  ;;  %1520 = vmatprep.mubr.bf16.mxu1 %v1087_v16  ;;  %v1041_v39 = vmax.f32 %v859_v19, 0.0  ;;  %v1043_v40 = vmax.f32 %v972_v22, 0.0 }
 0x178   : > { %v862_v31 = vpop.f32.mrf.mxu0  ;;  %v975_v32 = vpop.f32.mrf.mxu1  ;;  %1424 = vmatmul.mubr.bf16.gmra.mxu0 %v1084_v17  ;;  %1521 = vmatmul.mubr.bf16.gmra.mxu1 %v1086_v18 }
 0x179   : > { %v863_v33 = vadd.f32 %v862_v31, %v2549_v25  ;;  %v976_v34 = vadd.f32 %v975_v32, %v2551_v26  ;;  %v1044_v35 = vmax.f32 %v861_v23, 0.0  ;;  %v1046_v36 = vmax.f32 %v974_v24, 0.0 }
 0x17a   : > { %v866_v37 = vpop.f32.mrf.mxu0  ;;  %v979_v38 = vpop.f32.mrf.mxu1 }
 0x17b   : > { %v1045_v41 = vmax.f32 %v863_v33, 0.0  ;;  %v1047_v42 = vmax.f32 %v976_v34, 0.0  ;;  %v1088_v49 = vpack.c.bf16 %v1044_v35, %v1040_v43  ;;  %v1090_v50 = vpack.c.bf16 %v1046_v36, %v1042_v44 }
 0x17c   : > { %v868_v45 = vpop.f32.mrf.mxu0  ;;  %v981_v46 = vpop.f32.mrf.mxu1  ;;  %v867_v57 = vadd.f32 %v866_v37, %v2553_v27  ;;  %v980_v58 = vadd.f32 %v979_v38, %v2555_v28 }
 0x17d   : > { %v1089_v47 = vpack.c.bf16 %v1045_v41, %v1041_v39  ;;  %v1091_v48 = vpack.c.bf16 %v1047_v42, %v1043_v40  ;;  %v869_v51 = vadd.f32 %v868_v45, %v2549_v25  ;;  %v982_v54 = vadd.f32 %v981_v46, %v2551_v26 }
 0x17e   : > { %v870_v52 = vpop.f32.mrf.mxu0  ;;  %v983_v53 = vpop.f32.mrf.mxu1  ;;  %v1048_v7 = vmax.f32 %v867_v57, 0.0  ;;  %v1050_v8 = vmax.f32 %v980_v58, 0.0 }
 0x17f   : > { %v871_v55 = vadd.f32 %v870_v52, %v2553_v27  ;;  %v984_v56 = vadd.f32 %v983_v53, %v2555_v28  ;;  %1431 = vmatprep.mubr.bf16.mxu0 %v1089_v47  ;;  %1528 = vmatprep.mubr.bf16.mxu1 %v1091_v48  ;;  %v1049_v3 = vmax.f32 %v869_v51, 0.0  ;;  %v1051_v4 = vmax.f32 %v982_v54, 0.0 }
 0x180   : > { %v872_v59 = vpop.f32.mrf.mxu0  ;;  %v985_v60 = vpop.f32.mrf.mxu1  ;;  %1432 = vmatmul.mubr.bf16.gmra.mxu0 %v1088_v49  ;;  %1529 = vmatmul.mubr.bf16.gmra.mxu1 %v1090_v50 }
 0x181   : > { %v873_v61 = vadd.f32 %v872_v59, %v2549_v25  ;;  %v986_v62 = vadd.f32 %v985_v60, %v2551_v26  ;;  %v1052_v63 = vmax.f32 %v871_v55, 0.0  ;;  %v1054_v0 = vmax.f32 %v984_v56, 0.0 }
 0x182   : > { %v876_v1 = vpop.f32.mrf.mxu0  ;;  %v989_v2 = vpop.f32.mrf.mxu1 }
 0x183   : > { %v1053_v5 = vmax.f32 %v873_v61, 0.0  ;;  %v1055_v6 = vmax.f32 %v986_v62, 0.0  ;;  %v1092_v13 = vpack.c.bf16 %v1052_v63, %v1048_v7  ;;  %v1094_v14 = vpack.c.bf16 %v1054_v0, %v1050_v8  ;;  %v2624_v7 = vld [vmem:[%s2667_s4] ss:$0 sm:$0xff] }
 0x184   : > { %v878_v9 = vpop.f32.mrf.mxu0  ;;  %v991_v10 = vpop.f32.mrf.mxu1  ;;  %v877_v21 = vadd.f32 %v876_v1, %v2553_v27  ;;  %v990_v22 = vadd.f32 %v989_v2, %v2555_v28 }
 0x185   : > { %v1093_v11 = vpack.c.bf16 %v1053_v5, %v1049_v3  ;;  %v1095_v12 = vpack.c.bf16 %v1055_v6, %v1051_v4  ;;  %v879_v15 = vadd.f32 %v878_v9, %v2549_v25  ;;  %v992_v18 = vadd.f32 %v991_v10, %v2551_v26 }
 0x186   : > { %v880_v16 = vpop.f32.mrf.mxu0  ;;  %v993_v17 = vpop.f32.mrf.mxu1  ;;  %v1056_v39 = vmax.f32 %v877_v21, 0.0  ;;  %v1058_v40 = vmax.f32 %v990_v22, 0.0 }
 0x187   : > { %v881_v19 = vadd.f32 %v880_v16, %v2553_v27  ;;  %v994_v20 = vadd.f32 %v993_v17, %v2555_v28  ;;  %1439 = vmatprep.mubr.bf16.mxu0 %v1093_v11  ;;  %1536 = vmatprep.mubr.bf16.mxu1 %v1095_v12  ;;  %v1057_v35 = vmax.f32 %v879_v15, 0.0  ;;  %v1059_v36 = vmax.f32 %v992_v18, 0.0 }
 0x188   : > { %v882_v23 = vpop.f32.mrf.mxu0  ;;  %v995_v24 = vpop.f32.mrf.mxu1  ;;  %1440 = vmatmul.mubr.bf16.gmra.mxu0 %v1092_v13  ;;  %1537 = vmatmul.mubr.bf16.gmra.mxu1 %v1094_v14 }
 0x189   : > { %v883_v29 = vadd.f32 %v882_v23, %v2549_v25  ;;  %v996_v30 = vadd.f32 %v995_v24, %v2551_v26  ;;  %v1060_v31 = vmax.f32 %v881_v19, 0.0  ;;  %v1062_v32 = vmax.f32 %v994_v20, 0.0 }
 0x18a   : > { %v886_v33 = vpop.f32.mrf.mxu0  ;;  %v999_v34 = vpop.f32.mrf.mxu1 }
 0x18b   : > { %v1061_v37 = vmax.f32 %v883_v29, 0.0  ;;  %v1063_v38 = vmax.f32 %v996_v30, 0.0  ;;  %v1096_v45 = vpack.c.bf16 %v1060_v31, %v1056_v39  ;;  %v1098_v46 = vpack.c.bf16 %v1062_v32, %v1058_v40 }
 0x18c   : > { %v888_v41 = vpop.f32.mrf.mxu0  ;;  %v1001_v42 = vpop.f32.mrf.mxu1  ;;  %v887_v53 = vadd.f32 %v886_v33, %v2553_v27  ;;  %v1000_v54 = vadd.f32 %v999_v34, %v2555_v28 }
 0x18d   : > { %v1097_v43 = vpack.c.bf16 %v1061_v37, %v1057_v35  ;;  %v1099_v44 = vpack.c.bf16 %v1063_v38, %v1059_v36  ;;  %v889_v47 = vadd.f32 %v888_v41, %v2549_v25  ;;  %v1002_v50 = vadd.f32 %v1001_v42, %v2551_v26 }
 0x18e   : > { %v890_v48 = vpop.f32.mrf.mxu0  ;;  %v1003_v49 = vpop.f32.mrf.mxu1  ;;  %v1064_v1 = vmax.f32 %v887_v53, 0.0  ;;  %v1066_v2 = vmax.f32 %v1000_v54, 0.0 }
 0x18f   : > { %v891_v51 = vadd.f32 %v890_v48, %v2553_v27  ;;  %v1004_v52 = vadd.f32 %v1003_v49, %v2555_v28  ;;  %1447 = vmatprep.mubr.bf16.mxu0 %v1097_v43  ;;  %1544 = vmatprep.mubr.bf16.mxu1 %v1099_v44  ;;  %v1065_v61 = vmax.f32 %v889_v47, 0.0  ;;  %v1067_v62 = vmax.f32 %v1002_v50, 0.0 }
 0x190   : > { %v892_v55 = vpop.f32.mrf.mxu0  ;;  %v1005_v56 = vpop.f32.mrf.mxu1  ;;  %1448 = vmatmul.mubr.bf16.gmra.mxu0 %v1096_v45  ;;  %1545 = vmatmul.mubr.bf16.gmra.mxu1 %v1098_v46 }
 0x191   : > { %v893_v57 = vadd.f32 %v892_v55, %v2549_v25  ;;  %v1006_v58 = vadd.f32 %v1005_v56, %v2551_v26  ;;  %v1068_v59 = vmax.f32 %v891_v51, 0.0  ;;  %v1070_v60 = vmax.f32 %v1004_v52, 0.0 }
 0x193   : > { %v1069_v63 = vmax.f32 %v893_v57, 0.0  ;;  %v1071_v0 = vmax.f32 %v1006_v58, 0.0  ;;  %v1100_v4 = vpack.c.bf16 %v1068_v59, %v1064_v1  ;;  %v1102_v28 = vpack.c.bf16 %v1070_v60, %v1066_v2 }
 0x195   : > { %v1101_v3 = vpack.c.bf16 %v1069_v63, %v1065_v61  ;;  %v1103_v27 = vpack.c.bf16 %v1071_v0, %v1067_v62 }
 0x197   : > { %1455 = vmatprep.mubr.bf16.mxu0 %v1101_v3  ;;  %1552 = vmatprep.mubr.bf16.mxu1 %v1103_v27 }
 0x198   : > { %1456 = vmatmul.mubr.bf16.gmra.mxu0 %v1100_v4  ;;  %1553 = vmatmul.mubr.bf16.gmra.mxu1 %v1102_v28 }
 0x220   : > { %v1876_v5 = vpop.f32.mrf.mxu0  ;;  %v1940_v25 = vpop.f32.mrf.mxu1 }
 0x222   : > { %v1877_v6 = vpop.f32.mrf.mxu0  ;;  %v1941_v26 = vpop.f32.mrf.mxu1 }
 0x223   : > { %v1878_v8 = vadd.f32 %v1877_v6, %v1876_v5  ;;  %v1942_v11 = vadd.f32 %v1941_v26, %v1940_v25 }
 0x224   : > { %v1879_v9 = vpop.f32.mrf.mxu0  ;;  %v1943_v10 = vpop.f32.mrf.mxu1 }
 0x225   : > { %v1402_v12 = vadd.f32 %v1878_v8, %v2624_v7 }
 0x226   : > { %v1880_v13 = vpop.f32.mrf.mxu0  ;;  %v1944_v14 = vpop.f32.mrf.mxu1 }
 0x227   : > { %v1881_v15 = vadd.f32 %v1880_v13, %v1879_v9  ;;  %v1499_v16 = vadd.f32 %v1942_v11, %v1402_v12  ;;  %v1945_v20 = vadd.f32 %v1944_v14, %v1943_v10 }
 0x228   : > { %v1882_v17 = vpop.f32.mrf.mxu0  ;;  %v1946_v18 = vpop.f32.mrf.mxu1 }
 0x229   : > { %v1405_v19 = vadd.f32 %v1881_v15, %v2624_v7  ;;  %v1561_v21 = vmax.f32 %v1499_v16, 0.0 }
 0x22a   : > { %v1883_v22 = vpop.f32.mrf.mxu0  ;;  %v1947_v23 = vpop.f32.mrf.mxu1 }
 0x22b   : > { %v1884_v24 = vadd.f32 %v1883_v22, %v1882_v17  ;;  %1577 = vxpose.xlu0.b32.start [1/16] %v1561_v21, 128  ;;  %v1502_v29 = vadd.f32 %v1945_v20, %v1405_v19  ;;  %v1948_v33 = vadd.f32 %v1947_v23, %v1946_v18 }
 0x22c   : > { %v1885_v30 = vpop.f32.mrf.mxu0  ;;  %v1949_v31 = vpop.f32.mrf.mxu1 }
 0x22d   : > { %v1410_v32 = vadd.f32 %v1884_v24, %v2624_v7  ;;  %v1562_v34 = vmax.f32 %v1502_v29, 0.0 }
 0x22e   : > { %v1886_v35 = vpop.f32.mrf.mxu0  ;;  %v1950_v36 = vpop.f32.mrf.mxu1 }
 0x22f   : > { %v1887_v37 = vadd.f32 %v1886_v35, %v1885_v30  ;;  %1578 = vxpose.xlu0.b32.cont [2/16] %v1562_v34, 128  ;;  %v1507_v38 = vadd.f32 %v1948_v33, %v1410_v32  ;;  %v1951_v42 = vadd.f32 %v1950_v36, %v1949_v31 }
 0x230   : > { %v1888_v39 = vpop.f32.mrf.mxu0  ;;  %v1952_v40 = vpop.f32.mrf.mxu1 }
 0x231   : > { %v1413_v41 = vadd.f32 %v1887_v37, %v2624_v7  ;;  %v1563_v43 = vmax.f32 %v1507_v38, 0.0 }
 0x232   : > { %v1889_v44 = vpop.f32.mrf.mxu0  ;;  %v1953_v45 = vpop.f32.mrf.mxu1 }
 0x233   : > { %v1890_v46 = vadd.f32 %v1889_v44, %v1888_v39  ;;  %1579 = vxpose.xlu0.b32.cont [3/16] %v1563_v43, 128  ;;  %v1510_v47 = vadd.f32 %v1951_v42, %v1413_v41  ;;  %v1954_v51 = vadd.f32 %v1953_v45, %v1952_v40 }
 0x234   : > { %v1891_v48 = vpop.f32.mrf.mxu0  ;;  %v1955_v49 = vpop.f32.mrf.mxu1 }
 0x235   : > { %v1418_v50 = vadd.f32 %v1890_v46, %v2624_v7  ;;  %v1564_v52 = vmax.f32 %v1510_v47, 0.0 }
 0x236   : > { %v1892_v53 = vpop.f32.mrf.mxu0  ;;  %v1956_v54 = vpop.f32.mrf.mxu1 }
 0x237   : > { %v1893_v55 = vadd.f32 %v1892_v53, %v1891_v48  ;;  %1580 = vxpose.xlu0.b32.cont [4/16] %v1564_v52, 128  ;;  %v1515_v56 = vadd.f32 %v1954_v51, %v1418_v50  ;;  %v1957_v60 = vadd.f32 %v1956_v54, %v1955_v49 }
 0x238   : > { %v1894_v57 = vpop.f32.mrf.mxu0  ;;  %v1958_v58 = vpop.f32.mrf.mxu1 }
 0x239   : > { %v1421_v59 = vadd.f32 %v1893_v55, %v2624_v7  ;;  %v1565_v61 = vmax.f32 %v1515_v56, 0.0 }
 0x23a   : > { %v1895_v62 = vpop.f32.mrf.mxu0  ;;  %v1959_v63 = vpop.f32.mrf.mxu1 }
 0x23b   : > { %v1896_v0 = vadd.f32 %v1895_v62, %v1894_v57  ;;  %1581 = vxpose.xlu0.b32.cont [5/16] %v1565_v61, 128  ;;  %v1518_v1 = vadd.f32 %v1957_v60, %v1421_v59  ;;  %v1960_v4 = vadd.f32 %v1959_v63, %v1958_v58 }
 0x23c   : > { %v1897_v2 = vpop.f32.mrf.mxu0  ;;  %v1961_v3 = vpop.f32.mrf.mxu1 }
 0x23d   : > { %v1426_v27 = vadd.f32 %v1896_v0, %v2624_v7  ;;  %v1566_v28 = vmax.f32 %v1518_v1, 0.0 }
 0x23e   : > { %v1898_v5 = vpop.f32.mrf.mxu0  ;;  %v1962_v25 = vpop.f32.mrf.mxu1 }
 0x23f   : > { %v1899_v6 = vadd.f32 %v1898_v5, %v1897_v2  ;;  %1582 = vxpose.xlu0.b32.cont [6/16] %v1566_v28, 128  ;;  %v1523_v26 = vadd.f32 %v1960_v4, %v1426_v27  ;;  %v1963_v11 = vadd.f32 %v1962_v25, %v1961_v3 }
 0x240   : > { %v1900_v8 = vpop.f32.mrf.mxu0  ;;  %v1964_v9 = vpop.f32.mrf.mxu1 }
 0x241   : > { %v1429_v10 = vadd.f32 %v1899_v6, %v2624_v7  ;;  %v1567_v12 = vmax.f32 %v1523_v26, 0.0 }
 0x242   : > { %v1901_v13 = vpop.f32.mrf.mxu0  ;;  %v1965_v14 = vpop.f32.mrf.mxu1 }
 0x243   : > { %v1902_v15 = vadd.f32 %v1901_v13, %v1900_v8  ;;  %1583 = vxpose.xlu0.b32.cont [7/16] %v1567_v12, 128  ;;  %v1526_v16 = vadd.f32 %v1963_v11, %v1429_v10  ;;  %v1966_v20 = vadd.f32 %v1965_v14, %v1964_v9 }
 0x244   : > { %v1903_v17 = vpop.f32.mrf.mxu0  ;;  %v1967_v18 = vpop.f32.mrf.mxu1 }
 0x245   : > { %v1434_v19 = vadd.f32 %v1902_v15, %v2624_v7  ;;  %v1568_v21 = vmax.f32 %v1526_v16, 0.0 }
 0x246   : > { %v1904_v22 = vpop.f32.mrf.mxu0  ;;  %v1968_v23 = vpop.f32.mrf.mxu1 }
 0x247   : > { %v1905_v24 = vadd.f32 %v1904_v22, %v1903_v17  ;;  %1584 = vxpose.xlu0.b32.cont [8/16] %v1568_v21, 128  ;;  %v1531_v29 = vadd.f32 %v1966_v20, %v1434_v19  ;;  %v1969_v33 = vadd.f32 %v1968_v23, %v1967_v18  ;;  %v2342_v22 = vmov 0.0  }
 0x248   : > { %v1906_v30 = vpop.f32.mrf.mxu0  ;;  %v1970_v31 = vpop.f32.mrf.mxu1  ;;  %1997 = vmatprep.subr.bf16.mxu0 %v2342_v22  ;;  %2013 = vmatprep.mubr.msk.bf16.mxu0 %vm2343_vm0, %v2342_v22 }
 0x249   : > { %v1437_v32 = vadd.f32 %v1905_v24, %v2624_v7  ;;  %v1569_v34 = vmax.f32 %v1531_v29, 0.0 }
 0x24a   : > { %v1907_v35 = vpop.f32.mrf.mxu0  ;;  %v1971_v36 = vpop.f32.mrf.mxu1 }
 0x24b   : > { %v1908_v37 = vadd.f32 %v1907_v35, %v1906_v30  ;;  %1585 = vxpose.xlu0.b32.cont [9/16] %v1569_v34, 128  ;;  %v1534_v38 = vadd.f32 %v1969_v33, %v1437_v32  ;;  %v1972_v42 = vadd.f32 %v1971_v36, %v1970_v31 }
 0x24c   : > { %v1909_v39 = vpop.f32.mrf.mxu0  ;;  %v1973_v40 = vpop.f32.mrf.mxu1 }
 0x24d   : > { %v1442_v41 = vadd.f32 %v1908_v37, %v2624_v7  ;;  %v1570_v43 = vmax.f32 %v1534_v38, 0.0 }
 0x24e   : > { %v1910_v44 = vpop.f32.mrf.mxu0  ;;  %v1974_v45 = vpop.f32.mrf.mxu1 }
 0x24f   : > { %v1911_v46 = vadd.f32 %v1910_v44, %v1909_v39  ;;  %1586 = vxpose.xlu0.b32.cont [10/16] %v1570_v43, 128  ;;  %v1539_v47 = vadd.f32 %v1972_v42, %v1442_v41  ;;  %v1975_v51 = vadd.f32 %v1974_v45, %v1973_v40 }
 0x250   : > { %v1912_v48 = vpop.f32.mrf.mxu0  ;;  %v1976_v49 = vpop.f32.mrf.mxu1 }
 0x251   : > { %v1445_v50 = vadd.f32 %v1911_v46, %v2624_v7  ;;  %v1571_v52 = vmax.f32 %v1539_v47, 0.0 }
 0x252   : > { %v1913_v53 = vpop.f32.mrf.mxu0  ;;  %v1977_v54 = vpop.f32.mrf.mxu1 }
 0x253   : > { %v1914_v55 = vadd.f32 %v1913_v53, %v1912_v48  ;;  %1587 = vxpose.xlu0.b32.cont [11/16] %v1571_v52, 128  ;;  %v1542_v56 = vadd.f32 %v1975_v51, %v1445_v50  ;;  %v1978_v60 = vadd.f32 %v1977_v54, %v1976_v49  ;;  %v1617_v50 = vld [vmem:[%s2668_s5] sm:$0x1]  ;;  %v1619_v51 = vstv %s1618_s20 }
 0x254   : > { %v1915_v57 = vpop.f32.mrf.mxu0  ;;  %v1979_v58 = vpop.f32.mrf.mxu1 }
 0x255   : > { %v1450_v59 = vadd.f32 %v1914_v55, %v2624_v7  ;;  %v1572_v61 = vmax.f32 %v1542_v56, 0.0 }
 0x256   : > { %v1916_v62 = vpop.f32.mrf.mxu0  ;;  %v1980_v63 = vpop.f32.mrf.mxu1 }
 0x257   : > { %v1917_v0 = vadd.f32 %v1916_v62, %v1915_v57  ;;  %1588 = vxpose.xlu0.b32.cont [12/16] %v1572_v61, 128  ;;  %v1547_v1 = vadd.f32 %v1978_v60, %v1450_v59  ;;  %v1981_v4 = vadd.f32 %v1980_v63, %v1979_v58 }
 0x258   : > { %v1918_v2 = vpop.f32.mrf.mxu0  ;;  %v1982_v3 = vpop.f32.mrf.mxu1 }
 0x259   : > { %v1453_v27 = vadd.f32 %v1917_v0, %v2624_v7  ;;  %v1573_v28 = vmax.f32 %v1547_v1, 0.0 }
 0x25a   : > { %v1919_v5 = vpop.f32.mrf.mxu0  ;;  %v1983_v25 = vpop.f32.mrf.mxu1 }
 0x25b   : > { %v1920_v6 = vadd.f32 %v1919_v5, %v1918_v2  ;;  %1589 = vxpose.xlu0.b32.cont [13/16] %v1573_v28, 128  ;;  %v1550_v26 = vadd.f32 %v1981_v4, %v1453_v27  ;;  %v1984_v11 = vadd.f32 %v1983_v25, %v1982_v3 }
 0x25c   : > { %v1921_v8 = vpop.f32.mrf.mxu0  ;;  %v1985_v9 = vpop.f32.mrf.mxu1 }
 0x25d   : > { %v1458_v10 = vadd.f32 %v1920_v6, %v2624_v7  ;;  %v1574_v12 = vmax.f32 %v1550_v26, 0.0 }
 0x25e   : > { %v1922_v13 = vpop.f32.mrf.mxu0  ;;  %v1986_v14 = vpop.f32.mrf.mxu1 }
 0x25f   : > { %v1923_v15 = vadd.f32 %v1922_v13, %v1921_v8  ;;  %1590 = vxpose.xlu0.b32.cont [14/16] %v1574_v12, 128  ;;  %v1555_v16 = vadd.f32 %v1984_v11, %v1458_v10  ;;  %v1987_v18 = vadd.f32 %v1986_v14, %v1985_v9 }
 0x261   : > { %v1461_v17 = vadd.f32 %v1923_v15, %v2624_v7  ;;  %v1575_v19 = vmax.f32 %v1555_v16, 0.0 }
 0x263   : > { %1591 = vxpose.xlu0.b32.cont [15/16] %v1575_v19, 128  ;;  %v1558_v20 = vadd.f32 %v1987_v18, %v1461_v17 }
 0x265   : > { %v1576_v21 = vmax.f32 %v1558_v20, 0.0 }
 0x267   : > { %1592 = vxpose.xlu0.b32.end [16/16] %v1576_v21, 128 }
 0x2a7   : > { %v1593_v23 = vpop.trf.xlu0 }
 0x2ab   : > { %v1594_v24 = vpop.trf.xlu0 }
 0x2ac   : > { %v1609_v29 = vpack.c.bf16 %v1594_v24, %v1593_v23 }
 0x2af   : > { %v1595_v30 = vpop.trf.xlu0 }
 0x2b3   : > { %v1596_v31 = vpop.trf.xlu0 }
 0x2b4   : > { %v1610_v32 = vpack.c.bf16 %v1596_v31, %v1595_v30 }
 0x2b7   : > { %v1597_v33 = vpop.trf.xlu0 }
 0x2bb   : > { %v1598_v34 = vpop.trf.xlu0 }
 0x2bc   : > { %v1611_v49 = vpack.c.bf16 %v1598_v34, %v1597_v33 }
 0x2bf   : > { %v1599_v35 = vpop.trf.xlu0 }
 0x2c3   : > { %v1600_v7 = vpop.trf.xlu0 }
 0x2c4   : > { %v1612_v48 = vpack.c.bf16 %v1600_v7, %v1599_v35 }
 0x2c7   : > { %v1601_v36 = vpop.trf.xlu0 }
 0x2cb   : > { %v1602_v37 = vpop.trf.xlu0 }
 0x2cc   : > { %v1613_v47 = vpack.c.bf16 %v1602_v37, %v1601_v36 }
 0x2cf   : > { %v1603_v38 = vpop.trf.xlu0 }
 0x2d3   : > { %v1604_v39 = vpop.trf.xlu0 }
 0x2d4   : > { %v1614_v46 = vpack.c.bf16 %v1604_v39, %v1603_v38 }
 0x2d7   : > { %v1605_v40 = vpop.trf.xlu0 }
 0x2db   : > { %v1606_v41 = vpop.trf.xlu0 }
 0x2dc   : > { %v1615_v45 = vpack.c.bf16 %v1606_v41, %v1605_v40 }
 0x2df   : > { %v1607_v42 = vpop.trf.xlu0 }
 0x2e3   : > { %v1608_v43 = vpop.trf.xlu0 }
 0x2e4   : > { %v1616_v44 = vpack.c.bf16 %v1608_v43, %v1607_v42 }
 0x2e6   : > { %1998 = vmatpush3.bf16.msra.mxu0 %v1616_v44 }
 0x2e7   : > { %1999 = vmatprep.subr.bf16.mxu0 %v2342_v22 }
 0x2ea   : > { %2000 = vmatpush3.bf16.msra.mxu0 %v1615_v45 }
 0x2eb   : > { %2001 = vmatprep.subr.bf16.mxu0 %v2342_v22 }
 0x2ee   : > { %2002 = vmatpush3.bf16.msra.mxu0 %v1614_v46 }
 0x2ef   : > { %2003 = vmatprep.subr.bf16.mxu0 %v2342_v22 }
 0x2f2   : > { %2004 = vmatpush3.bf16.msra.mxu0 %v1613_v47 }
 0x2f3   : > { %2005 = vmatprep.subr.bf16.mxu0 %v2342_v22 }
 0x2f6   : > { %2006 = vmatpush3.bf16.msra.mxu0 %v1612_v48 }
 0x2f7   : > { %2007 = vmatprep.subr.bf16.mxu0 %v2342_v22 }
 0x2fa   : > { %2008 = vmatpush3.bf16.msra.mxu0 %v1611_v49 }
 0x2fb   : > { %2009 = vmatprep.subr.bf16.mxu0 %v2342_v22 }
 0x2fe   : > { %2010 = vmatpush3.bf16.msra.mxu0 %v1610_v32 }
 0x2ff   : > { %2011 = vmatprep.subr.bf16.mxu0 %v2342_v22 }
 0x302   : > { %2012 = vmatpush3.bf16.msra.mxu0 %v1609_v29 }
 0x305   : > { %2014 = vmatmul.mubr.bf16.vlgmr.msra.gmra.mxu0 %v1617_v50 }
 0x3c5   : > { %v1654_v52 = vpop.f32.mrf.mxu0 }
 0x3c6   : > { %v1655_v53 = vadd.f32 %v1654_v52, %v1619_v51 }
 0x3c7   : > { %v2015_v54 = vpop.f32.mrf.mxu0 }
 0x3c8   : > { %v1855_v55 = vmul.f32 -1.442695, %v1655_v53 }
 0x3c9   : > { %v1657_v56 = vpop.f32.mrf.mxu0 }
 0x3ca   : > { %2211 = vpow2.f32 %v1855_v55 }
 0x3cb   : > { %v2016_v57 = vpop.f32.mrf.mxu0 }
 0x3d7   : > { %v2212_v58 = vpop.eup %2211 }
 0x3d8   : > { %v1663_v59 = vadd.f32 1.0, %v2212_v58 }
 0x3da   : > { %2213 = vrcp.f32 %v1663_v59 }
 0x3e7   : > { %v2214_v60 = vpop.eup %2213 }
 0x3e8   : > { %1666 = vst [vmem:[%s326_s26] sm:$0x1] %v2214_v60 }
 0x3e9 PF: > { %p19_p12 = scmp.ge.s32.totalorder %s2452_s24, 4   ;;  %s2682_s26 = smov %s2325_s27 }
 0x3ea   : > { %s2683_s27 = smov %s2329_s28  ;;  %s2684_s28 = smov %s2461_s9 }
 0x3eb   : > { %s2685_s29 = smov %s2452_s24  ;;  %21 = sbr.rel (!%p19_p12) target bundleno = 6 (0x6), region = 96 }
 0x3f0   :  { %1684 = vsyncpa [#allocation4], 1 }
 0x3f1   :  { %1686 = vsyncpa [#allocation4 + $0x1], 1 }
 0x3f2   :  { %1687 = vsyncpa [#allocation6], 1 }

// kernel: squeeze.1
= control target key start
LH: loop header
LB: loop body
LE: loop exit
PB: predicated region body
PF: predicated region fallthrough
CT: control target
= control target key end

     0   :  { %vm8_vm0 = vcmask 261120   ;;  %s65_s8 = smov 32   ;;  %s66_s9 = smov 64   ;;  %s96_s0 = inlined_call_operand.vmem [shape: f32[256], index: 0, kind: input, shape index: {}]   ;;  %s97_s1 = inlined_call_operand.vmem [shape: f32[4,2,32], index: 1, kind: output, shape index: {}]  }
   0x1   :  { %v5_v0 = vld [vmem:[%s96_s0] sm:$0x3]  ;;  %s64_s0 = smov 96  }
   0x2   :  { %6 = vst [vmem:[#allocation1] sm:$0x3] %v5_v0 }
   0x9   :  { %v10_v1 = vld [vmem:[#allocation1] sm:$0x3]  }
   0xa   :  { %v22_v2 = vld [vmem:[#allocation1] sm:$0x3]   ;;  %11 = vrot.lane.b32.xlu0 %v10_v1, %s64_s0 }
   0xb   :  { %23 = vrot.lane.b32.xlu1 %v22_v2, %s65_s8  ;;  %v7_v3 = vld [vmem:[#allocation1] sm:$0x3]  }
   0xc   :  { %v16_v4 = vld [vmem:[#allocation1] sm:$0x3]   ;;  %9 = vst.msk [vmem:[#allocation0] ss:$16 sm:$0x3] %vm8_vm0, %v7_v3  }
   0xe   :  { %17 = vrot.lane.b32.xlu0 %v16_v4, %s66_s9 }
  0x7c   :  { %v12_v5 = vpop.permute.xlu0 %11  }
  0x7d   :  { %v24_v6 = vpop.permute.xlu1 %23   ;;  %15 = vst.msk [vmem:[#allocation0 + $0x1] ss:$16 sm:$0x3] %vm8_vm0, %v12_v5  }
  0x7e   :  { %27 = vst.msk [vmem:[#allocation0 + $0x9] ss:$16 sm:$0x3] %vm8_vm0, %v24_v6  }
  0x80   :  { %v18_v7 = vpop.permute.xlu0 %17  }
  0x81   :  { %21 = vst.msk [vmem:[#allocation0 + $0x8] ss:$16 sm:$0x3] %vm8_vm0, %v18_v7  }
  0x84   :  { %v32_v8 = vld [vmem:[#allocation0] sm:$0x3]  ;;  %v43_v9 = vld [vmem:[#allocation0 + $0x10] sm:$0x3] }
  0x85   :  { %35 = vst [vmem:[%s97_s1] sm:$0x3] %v32_v8  ;;  %59 = vst [vmem:[%s97_s1 + $0x4] sm:$0x3] %v43_v9 }
  0x88   :  { %v37_v10 = vld [vmem:[#allocation0 + $0x8] sm:$0x3]  ;;  %v50_v11 = vld [vmem:[#allocation0 + $0x18] sm:$0x3] }
  0x89   :  { %58 = vst [vmem:[%s97_s1 + $0x2] sm:$0x3] %v37_v10  ;;  %60 = vst [vmem:[%s97_s1 + $0x6] sm:$0x3] %v50_v11 }

// kernel: _lambda_.1
= control target key start
LH: loop header
LB: loop body
LE: loop exit
PB: predicated region body
PF: predicated region fallthrough
CT: control target
= control target key end

     0   :  { %s2663_s0 = inlined_call_operand.hbm [shape: f32[256,256], index: 0, kind: input, shape index: {}]   ;;  %s2664_s1 = inlined_call_operand.hbm [shape: bf16[256,512], index: 1, kind: input, shape index: {}]   ;;  %s2665_s2 = inlined_call_operand.vmem [shape: f32[1,512], index: 2, kind: input, shape index: {}]   ;;  %s2666_s3 = inlined_call_operand.hbm [shape: bf16[512,128], index: 3, kind: input, shape index: {}]   ;;  %s2667_s4 = inlined_call_operand.vmem [shape: f32[1,128], index: 4, kind: input, shape index: {}]   ;;  %s2668_s5 = inlined_call_operand.vmem [shape: bf16[1,128], index: 5, kind: input, shape index: {}]   ;;  %s2669_s6 = inlined_call_operand.<no memory space> [shape: f32[1,1], index: 6, kind: input, shape index: {}]   ;;  %s2670_s7 = inlined_call_operand.vmem [shape: f32[1,256], index: 7, kind: output, shape index: {}]  }
   0x1   :  { %12 = sst [smem:[#allocation2]] %s2669_s6 }
   0x2   :  { %13 = vsyncpa [#allocation4], 0 }
   0x3   :  { %15 = vsyncpa [#allocation4 + $0x1], 0 }
   0x4   :  { %16 = vsyncpa [#allocation6], 0  ;;  %s2387_s26 = smov 0   ;;  %s2389_s27 = smov 0  }
   0x5   :  { %s2391_s28 = smov 0   ;;  %s2393_s29 = smov 0  }
   0x6 LB: > { %s2406_s6 = sadd.s32 4294967295, %s2333_s29   ;;  %p42_p0 = scmp.ne.s32.totalorder %s2325_s27, %s2321_s26  ;;  %s2333_s29 = sphi %s2393_s29, %s2685_s29   ;;  %s2329_s28 = sphi %s2391_s28, %s2684_s28   ;;  %s2325_s27 = sphi %s2389_s27, %s2683_s27   ;;  %s2321_s26 = sphi %s2387_s26, %s2682_s26  }
   0x7   : > { %p2671_p1 = scmp.eq.s32.totalorder %s2406_s6, 0  ;;  %p1746_p2 = scmp.ge.s32.totalorder %s2333_s29, 1 }
   0x8   : > { %p205_p3 = scmp.lt.s32.totalorder %s2333_s29, 3  ;;  %s2335_s9 = smov [#allocation5]  }
   0x9   : > { %p2414_p4 = por %p2671_p1, %p42_p0  ;;  %s217_s10 = sshll.u32 %s2335_s9, 4  ;;  %s218_s10 = int_to_ptr.vmem [resolvable:$true] %s217_s10 }
   0xa   : > { %p2418_p5 = pnand %p1746_p2, %p205_p3  ;;  %s2336_s12 = smov [#allocation7]  }
   0xb   : > { %s2674_s30 = scalar_select %p2414_p4, 1, 0 }
   0xc   : > { %s2675_s8 = scalar_select %p2418_p5, 1, 0 }
   0xd   : > { %p2027_p6 = pneg %p2418_p5  ;;  %s233_s13 = sshll.u32 %s2336_s12, 4  ;;  %s234_s13 = int_to_ptr.vmem [resolvable:$true] %s233_s13 }
   0xe   : > { %s2226_s14 = scalar_lea.vmem %s218_s10, 8192  ;;  %p2234_p12 = scmp.lt.s32.totalorder %s218_s10, %s218_s10 }
   0xf   : > { %p2426_p7 = pnand %p2027_p6, %p2671_p1  ;;  %p2227_p9 = scmp.ne.s32.totalorder %s218_s10, %s2226_s14 }
  0x10   : > { %p2235_p13 = scmp.lt.s32.totalorder %s2226_s14, %s2226_s14 }
  0x11   : > { %p2217_p8 = pneg %p2426_p7 }
  0x12   : > { %p2236_p0 = por %p2235_p13, %p2234_p12 }
  0x13   : > { %p2229_p10 = pnand %p2227_p9, %p2217_p8 }
  0x15   : > { %p2230_p11 = pneg %p2229_p10 }
  0x17   : > { %p2237_p2 = pnand %p2236_p0, %p2230_p11 }
  0x19   : > { %2240 = shalt.err (!%p2237_p2)
}
  0x1a   : > { %s2337_s15 = smov 256   ;;  %s2338_s16 = smov 16  }
  0x1b   : > { %2030 = dma.hbm_to_vmem [thread:$0]  (!%p2426_p7), %s2664_s1, 8192, %s218_s10, [#allocation6], %s2337_s15, %s2337_s15, %s2338_s16  }
  0x1c   : > { %s2252_s19 = scalar_lea.vmem %s234_s13, 4096  ;;  %p2260_p10 = scmp.lt.s32.totalorder %s234_s13, %s234_s13 }
  0x1d   : > { %p2253_p3 = scmp.ne.s32.totalorder %s234_s13, %s2252_s19  ;;  %p2261_p11 = scmp.lt.s32.totalorder %s2252_s19, %s2252_s19 }
  0x1f   : > { %p2255_p6 = pnand %p2253_p3, %p2217_p8  ;;  %p2262_p12 = por %p2261_p11, %p2260_p10 }
  0x21   : > { %p2256_p9 = pneg %p2255_p6 }
  0x23   : > { %p2263_p13 = pnand %p2262_p12, %p2256_p9 }
  0x25   : > { %2266 = shalt.err (!%p2263_p13)
}
  0x26   : > { %s2339_s20 = smov 64   ;;  %s2340_s21 = smov 4  }
  0x27   : > { %2033 = dma.hbm_to_vmem [thread:$0]  (!%p2426_p7), %s2666_s3, 4096, %s234_s13, [#allocation6], %s2339_s20, %s2339_s20, %s2340_s21  }
  0x28   : > { %s2452_s24 = sadd.s32 1, %s2333_s29   ;;  %s29_s26 = sadd.s32 1, %s2329_s28 }
  0x29   : > { %s26_s25 = ssub.s32 %s2333_s29, %s2452_s24  ;;  %p36_p0 = scmp.ne.s32.totalorder %s2329_s28, %s2325_s27 }
  0x2a   : > { %p27_p8 = scmp.eq.s32.totalorder %s26_s25, 0  ;;  %p37_p2 = scmp.eq.s32.totalorder %s2333_s29, 0 }
  0x2b   : > { %p2040_p6 = scmp.lt.s32.totalorder %s2333_s29, 2  ;;  %s256_s10 = sand.u32 1, %s2329_s28  }
  0x2c   : > { %s2461_s9 = scalar_select %p27_p8, %s2329_s28, %s29_s26  }
  0x2d   : > { %p38_p3 = por %p37_p2, %p36_p0  ;;  %s1859_s12 = sshll.u32 %s2333_s29, 12 }
  0x2e   : > { %s1750_s14 = sshll.u32 %s256_s10, 8  ;;  %s2469_s18 = scalar_lea.hbm %s2663_s0, %s1859_s12 }
  0x2f   : > { %s260_s13 = scalar_lea.vmem [#allocation3], %s1750_s14  ;;  %p2471_p7 = pnand %p2040_p6, %p38_p3 }
  0x30   : > { %s268_s19 = sshll.u32 %s260_s13, 4  ;;  %s2477_s21 = scalar_lea.sflag [#allocation4], %s256_s10  ;;  %s2475_s19 = int_to_ptr.vmem [resolvable:$true] %s268_s19 }
  0x31   : > { %s2267_s29 = scalar_lea.hbm %s2469_s18, 4096  ;;  %p2269_p10 = pneg %p2471_p7 }
  0x32   : > { %p2268_p9 = scmp.ne.s32.totalorder %s2469_s18, %s2267_s29  ;;  %s2272_s25 = scalar_lea.hbm %s2663_s0, 8192 }
  0x33   : > { %p2273_p13 = scmp.lt.s32.totalorder %s2469_s18, %s2663_s0  ;;  %p2274_p8 = scmp.lt.s32.totalorder %s2272_s25, %s2267_s29 }
  0x34   : > { %p2270_p11 = pnand %p2269_p10, %p2268_p9 }
  0x35   : > { %p2275_p0 = por %p2274_p8, %p2273_p13 }
  0x36   : > { %p2271_p12 = pneg %p2270_p11 }
  0x38   : > { %p2276_p2 = pnand %p2275_p0, %p2271_p12 }
  0x3a   : > { %2279 = shalt.err (!%p2276_p2)
}
  0x3b   : > { %s2280_s10 = scalar_lea.vmem %s2475_s19, 4096  ;;  %s2341_s14 = smov [#allocation3]  }
  0x3c   : > { %p2281_p3 = scmp.ne.s32.totalorder %s2475_s19, %s2280_s10  ;;  %s2285_s11 = sshll.u32 %s2341_s14, 4  ;;  %s2286_s11 = int_to_ptr.vmem [resolvable:$false] %s2285_s11 }
  0x3d   : > { %s2287_s17 = scalar_lea.vmem %s2286_s11, 8192  ;;  %p2288_p11 = scmp.lt.s32.totalorder %s2475_s19, %s2286_s11 }
  0x3e   : > { %p2283_p6 = pnand %p2281_p3, %p2269_p10  ;;  %p2289_p1 = scmp.lt.s32.totalorder %s2287_s17, %s2280_s10 }
  0x40   : > { %p2284_p9 = pneg %p2283_p6  ;;  %p2290_p4 = por %p2289_p1, %p2288_p11 }
  0x42   : > { %p2291_p5 = pnand %p2290_p4, %p2284_p9 }
  0x44   : > { %2294 = shalt.err (!%p2291_p5)
}
  0x45   : > { %2037 = dma.hbm_to_vmem [thread:$0]  (!%p2471_p7), %s2469_s18, 4096, %s2475_s19, %s2477_s21, %s2337_s15, %s2337_s15, %s2338_s16  }
  0x46   : > { %p2678_p10 = scmp.ne.s32.totalorder %s2675_s8, 0 }
  0x47   : > { %s282_s13 = sand.u32 (!%p2678_p10), 1, %s2325_s27   ;;  %p2679_p1 = scmp.ne.s32.totalorder (!%p2678_p10), %s2674_s30, 0 }
  0x48   : > { %280 = sbr.rel (%p2678_p10) target bundleno = 1001 (0x3e9), region = 48  ;;  %s1755_s29 = sshll.u32 (!%p2678_p10), %s282_s13, 8 }
  0x49   : > { %s283_s22 = scalar_lea.sflag (!%p2678_p10), [#allocation4], %s282_s13  ;;  %s2504_s23 = scalar_lea.vmem (!%p2678_p10), [#allocation3], %s1755_s29 }
  0x4d   : > { %2312 = dma.done.wait (%p2679_p1), %s283_s22, 4096  }
  0x4e   : > { %2314 = vsyncadd (%p2679_p1), %s283_s22, 4294963200  ;;  %p2680_p4 = scmp.eq.s32.totalorder %s2406_s6, 0 }
  0x50   : > { %2316 = dma.done.wait (%p2680_p4), [#allocation6], 12288   ;;  %p2681_p5 = pmov %p2680_p4 }
  0x51   : > { %v2083_v0 = vld [vmem:[#allocation5 + $0xe4] ss:$16 sps:$4 sm:$0xff]   ;;  %v2085_v1 = vld [vmem:[#allocation5 + $0xec] ss:$16 sps:$4 sm:$0xff]   ;;  %v2087_v2 = vld [vmem:[#allocation5 + $0xe0] ss:$16 sps:$4 sm:$0xff]  }
  0x52   : > { %2318 = vsyncadd (%p2681_p5), [#allocation6], 4294955008  ;;  %782 = vmatprep.subr.bf16.mxu0 %v2083_v0  ;;  %v2088_v3 = vld [vmem:[#allocation5 + $0xe8] ss:$16 sps:$4 sm:$0xff]   ;;  %895 = vmatprep.subr.bf16.mxu1 %v2085_v1  ;;  %v2089_v4 = vld [vmem:[#allocation5 + $0xc4] ss:$16 sps:$4 sm:$0xff]  }
  0x53   : > { %783 = vmatpush1.bf16.msra.mxu0 %v2087_v2  ;;  %896 = vmatpush1.bf16.msra.mxu1 %v2088_v3  ;;  %v2091_v5 = vld [vmem:[#allocation5 + $0xcc] ss:$16 sps:$4 sm:$0xff]   ;;  %v2093_v6 = vld [vmem:[#allocation5 + $0xc0] ss:$16 sps:$4 sm:$0xff]   ;;  %v2094_v7 = vld [vmem:[#allocation5 + $0xc8] ss:$16 sps:$4 sm:$0xff]  }
  0x54   : > { %784 = vmatprep.subr.bf16.mxu0 %v2089_v4  ;;  %897 = vmatprep.subr.bf16.mxu1 %v2091_v5  ;;  %v2095_v8 = vld [vmem:[#allocation5 + $0xa4] ss:$16 sps:$4 sm:$0xff]   ;;  %v2097_v9 = vld [vmem:[#allocation5 + $0xac] ss:$16 sps:$4 sm:$0xff]   ;;  %v2099_v10 = vld [vmem:[#allocation5 + $0xa0] ss:$16 sps:$4 sm:$0xff]  }
  0x55   : > { %v2100_v11 = vld [vmem:[#allocation5 + $0xa8] ss:$16 sps:$4 sm:$0xff]   ;;  %v2101_v12 = vld [vmem:[#allocation5 + $0x84] ss:$16 sps:$4 sm:$0xff]   ;;  %v2103_v13 = vld [vmem:[#allocation5 + $0x8c] ss:$16 sps:$4 sm:$0xff]  }
  0x56   : > { %v2105_v14 = vld [vmem:[#allocation5 + $0x80] ss:$16 sps:$4 sm:$0xff]   ;;  %v2106_v15 = vld [vmem:[#allocation5 + $0x88] ss:$16 sps:$4 sm:$0xff]   ;;  %v2107_v16 = vld [vmem:[#allocation5 + $0x64] ss:$16 sps:$4 sm:$0xff]  }
  0x57   : > { %785 = vmatpush1.bf16.msra.mxu0 %v2093_v6  ;;  %898 = vmatpush1.bf16.msra.mxu1 %v2094_v7  ;;  %v2109_v17 = vld [vmem:[#allocation5 + $0x6c] ss:$16 sps:$4 sm:$0xff]   ;;  %v2111_v18 = vld [vmem:[#allocation5 + $0x60] ss:$16 sps:$4 sm:$0xff]   ;;  %v2112_v19 = vld [vmem:[#allocation5 + $0x68] ss:$16 sps:$4 sm:$0xff]  }
  0x58   : > { %786 = vmatprep.subr.bf16.mxu0 %v2095_v8  ;;  %899 = vmatprep.subr.bf16.mxu1 %v2097_v9  ;;  %v2113_v20 = vld [vmem:[#allocation5 + $0x44] ss:$16 sps:$4 sm:$0xff]   ;;  %v2115_v21 = vld [vmem:[#allocation5 + $0x4c] ss:$16 sps:$4 sm:$0xff]   ;;  %v2117_v22 = vld [vmem:[#allocation5 + $0x40] ss:$16 sps:$4 sm:$0xff]  }
  0x59   : > { %v2118_v23 = vld [vmem:[#allocation5 + $0x48] ss:$16 sps:$4 sm:$0xff]   ;;  %v2119_v24 = vld [vmem:[#allocation5 + $0x24] ss:$16 sps:$4 sm:$0xff]   ;;  %v2121_v25 = vld [vmem:[#allocation5 + $0x2c] ss:$16 sps:$4 sm:$0xff]  }
  0x5a   : > { %v2123_v26 = vld [vmem:[#allocation5 + $0x20] ss:$16 sps:$4 sm:$0xff]   ;;  %v2124_v27 = vld [vmem:[#allocation5 + $0x28] ss:$16 sps:$4 sm:$0xff]   ;;  %v2125_v28 = vld [vmem:[#allocation5 + $0x4] ss:$16 sps:$4 sm:$0xff]  }
  0x5b   : > { %787 = vmatpush1.bf16.msra.mxu0 %v2099_v10  ;;  %900 = vmatpush1.bf16.msra.mxu1 %v2100_v11  ;;  %v2127_v29 = vld [vmem:[#allocation5 + $0xc] ss:$16 sps:$4 sm:$0xff]   ;;  %v2129_v30 = vld [vmem:[#allocation5] ss:$16 sps:$4 sm:$0xff]   ;;  %v2130_v31 = vld [vmem:[#allocation5 + $0x8] ss:$16 sps:$4 sm:$0xff]  }
  0x5c   : > { %788 = vmatprep.subr.bf16.mxu0 %v2101_v12  ;;  %901 = vmatprep.subr.bf16.mxu1 %v2103_v13  ;;  %v2131_v32 = vld [vmem:[#allocation5 + $0x1e4] ss:$16 sps:$4 sm:$0xff]   ;;  %v2133_v33 = vld [vmem:[#allocation5 + $0x1ec] ss:$16 sps:$4 sm:$0xff]   ;;  %v2135_v34 = vld [vmem:[#allocation5 + $0x1e0] ss:$16 sps:$4 sm:$0xff]  }
  0x5d   : > { %v2136_v35 = vld [vmem:[#allocation5 + $0x1e8] ss:$16 sps:$4 sm:$0xff]   ;;  %v2137_v36 = vld [vmem:[#allocation5 + $0x1c4] ss:$16 sps:$4 sm:$0xff]   ;;  %v2139_v37 = vld [vmem:[#allocation5 + $0x1cc] ss:$16 sps:$4 sm:$0xff]  }
  0x5e   : > { %v2141_v38 = vld [vmem:[#allocation5 + $0x1c0] ss:$16 sps:$4 sm:$0xff]   ;;  %v2142_v39 = vld [vmem:[#allocation5 + $0x1c8] ss:$16 sps:$4 sm:$0xff]   ;;  %v2143_v40 = vld [vmem:[#allocation5 + $0x1a4] ss:$16 sps:$4 sm:$0xff]  }
  0x5f   : > { %789 = vmatpush1.bf16.msra.mxu0 %v2105_v14  ;;  %902 = vmatpush1.bf16.msra.mxu1 %v2106_v15  ;;  %v2145_v41 = vld [vmem:[#allocation5 + $0x1ac] ss:$16 sps:$4 sm:$0xff]   ;;  %v2147_v42 = vld [vmem:[#allocation5 + $0x1a0] ss:$16 sps:$4 sm:$0xff]   ;;  %v2148_v43 = vld [vmem:[#allocation5 + $0x1a8] ss:$16 sps:$4 sm:$0xff]  }
  0x60   : > { %790 = vmatprep.subr.bf16.mxu0 %v2107_v16  ;;  %903 = vmatprep.subr.bf16.mxu1 %v2109_v17  ;;  %v2149_v44 = vld [vmem:[#allocation5 + $0x184] ss:$16 sps:$4 sm:$0xff]   ;;  %v2151_v45 = vld [vmem:[#allocation5 + $0x18c] ss:$16 sps:$4 sm:$0xff]   ;;  %v2153_v48 = vld [vmem:[#allocation5 + $0x180] ss:$16 sps:$4 sm:$0xff]  }
  0x61   : > { %v329_v46 = vld [vmem:[%s2504_s23 + $0x8] sm:$0xff]  ;;  %v331_v47 = vld [vmem:[%s2504_s23 + $0x18] sm:$0xff]  ;;  %v2155_v51 = vld [vmem:[#allocation5 + $0x164] ss:$16 sps:$4 sm:$0xff]   ;;  %vm2343_vm0 = vmmov 0   ;;  %s1618_s20 = sld [smem:[#allocation2]] }
  0x62   : > { %v2154_v49 = vld [vmem:[#allocation5 + $0x188] ss:$16 sps:$4 sm:$0xff]   ;;  %v361_v50 = vpack.c.bf16 %v331_v47, %v329_v46  ;;  %v2157_v52 = vld [vmem:[#allocation5 + $0x16c] ss:$16 sps:$4 sm:$0xff]   ;;  %v2159_v53 = vld [vmem:[#allocation5 + $0x160] ss:$16 sps:$4 sm:$0xff]  }
  0x63   : > { %791 = vmatpush1.bf16.msra.mxu0 %v2111_v18  ;;  %904 = vmatpush1.bf16.msra.mxu1 %v2112_v19  ;;  %v2160_v54 = vld [vmem:[#allocation5 + $0x168] ss:$16 sps:$4 sm:$0xff]   ;;  %v2161_v55 = vld [vmem:[#allocation5 + $0x144] ss:$16 sps:$4 sm:$0xff]   ;;  %v2163_v56 = vld [vmem:[#allocation5 + $0x14c] ss:$16 sps:$4 sm:$0xff]  }
  0x64   : > { %792 = vmatprep.subr.bf16.mxu0 %v2113_v20  ;;  %905 = vmatprep.subr.bf16.mxu1 %v2115_v21  ;;  %v2165_v57 = vld [vmem:[#allocation5 + $0x140] ss:$16 sps:$4 sm:$0xff]   ;;  %v2166_v58 = vld [vmem:[#allocation5 + $0x148] ss:$16 sps:$4 sm:$0xff]   ;;  %v2167_v59 = vld [vmem:[#allocation5 + $0x124] ss:$16 sps:$4 sm:$0xff]  }
  0x65   : > { %814 = vmatprep.mubr.bf16.mxu0 %v361_v50  ;;  %927 = vmatprep.mubr.bf16.mxu1 %v361_v50  ;;  %v2169_v60 = vld [vmem:[#allocation5 + $0x12c] ss:$16 sps:$4 sm:$0xff]   ;;  %v2171_v61 = vld [vmem:[#allocation5 + $0x120] ss:$16 sps:$4 sm:$0xff]   ;;  %v2172_v62 = vld [vmem:[#allocation5 + $0x128] ss:$16 sps:$4 sm:$0xff]  }
  0x66   : > { %v2173_v63 = vld [vmem:[#allocation5 + $0x104] ss:$16 sps:$4 sm:$0xff]   ;;  %v2175_v0 = vld [vmem:[#allocation5 + $0x10c] ss:$16 sps:$4 sm:$0xff]   ;;  %v2177_v1 = vld [vmem:[#allocation5 + $0x100] ss:$16 sps:$4 sm:$0xff]  }
  0x67   : > { %793 = vmatpush1.bf16.msra.mxu0 %v2117_v22  ;;  %906 = vmatpush1.bf16.msra.mxu1 %v2118_v23  ;;  %v2178_v2 = vld [vmem:[#allocation5 + $0x108] ss:$16 sps:$4 sm:$0xff]   ;;  %v328_v3 = vld [vmem:[%s2504_s23] sm:$0xff]  ;;  %v330_v4 = vld [vmem:[%s2504_s23 + $0x10] sm:$0xff]  ;;  %p324_p7 = scmp.lt.s32.totalorder %s2406_s6, 1 }
  0x68   : > { %794 = vmatprep.subr.bf16.mxu0 %v2119_v24  ;;  %907 = vmatprep.subr.bf16.mxu1 %v2121_v25  ;;  %v333_v5 = vld [vmem:[%s2504_s23 + $0x28] sm:$0xff]  ;;  %v335_v6 = vld [vmem:[%s2504_s23 + $0x38] sm:$0xff]  ;;  %v360_v9 = vpack.c.bf16 %v330_v4, %v328_v3  ;;  %v2183_v13 = vld [vmem:[#allocation7 + $0x70] sm:$0xff]  }
  0x69   : > { %v2179_v7 = vld [vmem:[#allocation7 + $0x78] sm:$0xff]   ;;  %v363_v11 = vpack.c.bf16 %v335_v6, %v333_v5  ;;  %v332_v14 = vld [vmem:[%s2504_s23 + $0x20] sm:$0xff]  ;;  %v334_v15 = vld [vmem:[%s2504_s23 + $0x30] sm:$0xff]  ;;  %s2687_s6 = smov (!%p324_p7, %s2406_s6), 1 }
  0x6a   : > { %v2180_v8 = vld [vmem:[#allocation7 + $0xf8] sm:$0xff]   ;;  %v2184_v16 = vld [vmem:[#allocation7 + $0xf0] sm:$0xff]   ;;  %v337_v17 = vld [vmem:[%s2504_s23 + $0x48] sm:$0xff]  ;;  %v362_v23 = vpack.c.bf16 %v334_v15, %v332_v14  ;;  %s326_s26 = scalar_lea.vmem %s2670_s7, %s2687_s6 }
  0x6b   : > { %795 = vmatpush1.bf16.msra.mxu0 %v2123_v26  ;;  %908 = vmatpush1.bf16.msra.mxu1 %v2124_v27  ;;  %v2181_v10 = vld [vmem:[#allocation7 + $0x38] sm:$0xff]   ;;  %v2185_v19 = vld [vmem:[#allocation7 + $0x30] sm:$0xff]   ;;  %v2187_v21 = vld [vmem:[#allocation7 + $0x68] sm:$0xff]  }
  0x6c   : > { %796 = vmatprep.subr.bf16.mxu0 %v2125_v28  ;;  %909 = vmatprep.subr.bf16.mxu1 %v2127_v29  ;;  %v2182_v12 = vld [vmem:[#allocation7 + $0xb8] sm:$0xff]   ;;  %v2186_v20 = vld [vmem:[#allocation7 + $0xb0] sm:$0xff]   ;;  %v2188_v22 = vld [vmem:[#allocation7 + $0xe8] sm:$0xff]  }
  0x6d   : > { %v339_v18 = vld [vmem:[%s2504_s23 + $0x58] sm:$0xff]  ;;  %v2189_v24 = vld [vmem:[#allocation7 + $0x28] sm:$0xff]   ;;  %v2191_v27 = vld [vmem:[#allocation7 + $0x60] sm:$0xff]  }
  0x6e   : > { %v365_v25 = vpack.c.bf16 %v339_v18, %v337_v17  ;;  %v2190_v26 = vld [vmem:[#allocation7 + $0xa8] sm:$0xff]   ;;  %v2192_v28 = vld [vmem:[#allocation7 + $0xe0] sm:$0xff]   ;;  %v351_v50 = vld [vmem:[%s2504_s23 + $0xb8] sm:$0xff] }
  0x6f   : > { %797 = vmatpush1.bf16.msra.mxu0 %v2129_v30  ;;  %910 = vmatpush1.bf16.msra.mxu1 %v2130_v31  ;;  %v336_v29 = vld [vmem:[%s2504_s23 + $0x40] sm:$0xff]  ;;  %v338_v30 = vld [vmem:[%s2504_s23 + $0x50] sm:$0xff]  ;;  %v341_v31 = vld [vmem:[%s2504_s23 + $0x68] sm:$0xff] }
  0x70   : > { %798 = vmatprep.subr.bf16.mxu0 %v2131_v32  ;;  %911 = vmatprep.subr.bf16.mxu1 %v2133_v33  ;;  %v343_v32 = vld [vmem:[%s2504_s23 + $0x78] sm:$0xff]  ;;  %v2193_v33 = vld [vmem:[#allocation7 + $0x20] sm:$0xff]   ;;  %v2199_v4 = vld [vmem:[#allocation7 + $0x50] sm:$0xff]  }
  0x71   : > { %v344_v47 = vld [vmem:[%s2504_s23 + $0x80] sm:$0xff]  ;;  %v2200_v5 = vld [vmem:[#allocation7 + $0xd0] sm:$0xff]  }
  0x72   : > { %v2201_v6 = vld [vmem:[#allocation7 + $0x10] sm:$0xff]   ;;  %v2209_v14 = vld [vmem:[#allocation7] sm:$0xff]  }
  0x73   : > { %799 = vmatpush2.bf16.msra.mxu0 %v2135_v34  ;;  %912 = vmatpush2.bf16.msra.mxu1 %v2136_v35  ;;  %v2194_v34 = vld [vmem:[#allocation7 + $0xa0] sm:$0xff]   ;;  %v2195_v35 = vld [vmem:[#allocation7 + $0x58] sm:$0xff]  }
  0x74   : > { %800 = vmatprep.subr.bf16.mxu0 %v2137_v36  ;;  %913 = vmatprep.subr.bf16.mxu1 %v2139_v37  ;;  %v2196_v36 = vld [vmem:[#allocation7 + $0xd8] sm:$0xff]   ;;  %v364_v37 = vpack.c.bf16 %v338_v30, %v336_v29  ;;  %v2210_v15 = vld [vmem:[#allocation7 + $0x80] sm:$0xff]  }
  0x77   : > { %801 = vmatpush2.bf16.msra.mxu0 %v2141_v38  ;;  %914 = vmatpush2.bf16.msra.mxu1 %v2142_v39  ;;  %v2197_v38 = vld [vmem:[#allocation7 + $0x18] sm:$0xff]   ;;  %v367_v39 = vpack.c.bf16 %v343_v32, %v341_v31 }
  0x78   : > { %802 = vmatprep.subr.bf16.mxu0 %v2143_v40  ;;  %915 = vmatprep.subr.bf16.mxu1 %v2145_v41  ;;  %v2198_v40 = vld [vmem:[#allocation7 + $0x98] sm:$0xff]   ;;  %v340_v41 = vld [vmem:[%s2504_s23 + $0x60] sm:$0xff] }
  0x7b   : > { %803 = vmatpush2.bf16.msra.mxu0 %v2147_v42  ;;  %916 = vmatpush2.bf16.msra.mxu1 %v2148_v43  ;;  %v342_v42 = vld [vmem:[%s2504_s23 + $0x70] sm:$0xff]  ;;  %v345_v43 = vld [vmem:[%s2504_s23 + $0x88] sm:$0xff] }
  0x7c   : > { %804 = vmatprep.subr.bf16.mxu0 %v2149_v44  ;;  %917 = vmatprep.subr.bf16.mxu1 %v2151_v45  ;;  %v347_v44 = vld [vmem:[%s2504_s23 + $0x98] sm:$0xff]  ;;  %v366_v45 = vpack.c.bf16 %v342_v42, %v340_v41 }
  0x7d   : > { %v369_v46 = vpack.c.bf16 %v347_v44, %v345_v43 }
  0x7f   : > { %805 = vmatpush2.bf16.msra.mxu0 %v2153_v48  ;;  %918 = vmatpush2.bf16.msra.mxu1 %v2154_v49  ;;  %v346_v48 = vld [vmem:[%s2504_s23 + $0x90] sm:$0xff]  ;;  %v349_v49 = vld [vmem:[%s2504_s23 + $0xa8] sm:$0xff] }
  0x80   : > { %806 = vmatprep.subr.bf16.mxu0 %v2155_v51  ;;  %919 = vmatprep.subr.bf16.mxu1 %v2157_v52  ;;  %v368_v51 = vpack.c.bf16 %v346_v48, %v344_v47  ;;  %v371_v52 = vpack.c.bf16 %v351_v50, %v349_v49 }
  0x83   : > { %807 = vmatpush2.bf16.msra.mxu0 %v2159_v53  ;;  %920 = vmatpush2.bf16.msra.mxu1 %v2160_v54  ;;  %v348_v53 = vld [vmem:[%s2504_s23 + $0xa0] sm:$0xff]  ;;  %v350_v54 = vld [vmem:[%s2504_s23 + $0xb0] sm:$0xff] }
  0x84   : > { %808 = vmatprep.subr.bf16.mxu0 %v2161_v55  ;;  %921 = vmatprep.subr.bf16.mxu1 %v2163_v56  ;;  %v353_v55 = vld [vmem:[%s2504_s23 + $0xc8] sm:$0xff]  ;;  %v355_v56 = vld [vmem:[%s2504_s23 + $0xd8] sm:$0xff] }
  0x87   : > { %809 = vmatpush2.bf16.msra.mxu0 %v2165_v57  ;;  %922 = vmatpush2.bf16.msra.mxu1 %v2166_v58  ;;  %v370_v57 = vpack.c.bf16 %v350_v54, %v348_v53  ;;  %v373_v58 = vpack.c.bf16 %v355_v56, %v353_v55 }
  0x88   : > { %810 = vmatprep.subr.bf16.mxu0 %v2167_v59  ;;  %923 = vmatprep.subr.bf16.mxu1 %v2169_v60  ;;  %v352_v59 = vld [vmem:[%s2504_s23 + $0xc0] sm:$0xff]  ;;  %v354_v60 = vld [vmem:[%s2504_s23 + $0xd0] sm:$0xff] }
  0x8b   : > { %811 = vmatpush2.bf16.msra.mxu0 %v2171_v61  ;;  %924 = vmatpush2.bf16.msra.mxu1 %v2172_v62  ;;  %v357_v61 = vld [vmem:[%s2504_s23 + $0xe8] sm:$0xff]  ;;  %v359_v62 = vld [vmem:[%s2504_s23 + $0xf8] sm:$0xff] }
  0x8c   : > { %812 = vmatprep.subr.bf16.mxu0 %v2173_v63  ;;  %925 = vmatprep.subr.bf16.mxu1 %v2175_v0  ;;  %v372_v63 = vpack.c.bf16 %v354_v60, %v352_v59  ;;  %v375_v0 = vpack.c.bf16 %v359_v62, %v357_v61 }
  0x8f   : > { %813 = vmatpush2.bf16.msra.mxu0 %v2177_v1  ;;  %926 = vmatpush2.bf16.msra.mxu1 %v2178_v2  ;;  %v356_v1 = vld [vmem:[%s2504_s23 + $0xe0] sm:$0xff]  ;;  %v358_v2 = vld [vmem:[%s2504_s23 + $0xf0] sm:$0xff] }
  0x90   : > { %1860 = vmatprep.subr.bf16.mxu0 %v2179_v7  ;;  %1924 = vmatprep.subr.bf16.mxu1 %v2180_v8  ;;  %v374_v3 = vpack.c.bf16 %v358_v2, %v356_v1  ;;  %v2202_v7 = vld [vmem:[#allocation7 + $0x90] sm:$0xff]   ;;  %v2203_v8 = vld [vmem:[#allocation7 + $0x48] sm:$0xff]  }
  0x92   : > { %815 = vmatmul.mubr.bf16.vlgmr.msra.gmra.mxu0 %v360_v9  ;;  %928 = vmatmul.mubr.bf16.vlgmr.msra.gmra.mxu1 %v360_v9  ;;  %v2204_v9 = vld [vmem:[#allocation7 + $0xc8] sm:$0xff]  }
  0x93   : > { %824 = vmatprep.mubr.bf16.mxu0 %v363_v11  ;;  %937 = vmatprep.mubr.bf16.mxu1 %v363_v11  ;;  %v2206_v11 = vld [vmem:[#allocation7 + $0x88] sm:$0xff]  }
  0x94   : > { %1861 = vmatpush3.bf16.msra.mxu0 %v2181_v10  ;;  %1925 = vmatpush3.bf16.msra.mxu1 %v2182_v12  ;;  %v2205_v10 = vld [vmem:[#allocation7 + $0x8] sm:$0xff]   ;;  %v2207_v12 = vld [vmem:[#allocation7 + $0x40] sm:$0xff]  }
  0x95   : > { %1862 = vmatprep.subr.bf16.mxu0 %v2183_v13  ;;  %1926 = vmatprep.subr.bf16.mxu1 %v2184_v16  ;;  %v2208_v13 = vld [vmem:[#allocation7 + $0xc0] sm:$0xff]   ;;  %v442_v16 = vlaneseq }
  0x97   : > { %v443_v17 = vshrl.u32 %v442_v16, 7 }
  0x98   : > { %1863 = vmatpush3.bf16.msra.mxu0 %v2185_v19  ;;  %1927 = vmatpush3.bf16.msra.mxu1 %v2186_v20 }
  0x99   : > { %1864 = vmatprep.subr.bf16.mxu0 %v2187_v21  ;;  %1928 = vmatprep.subr.bf16.mxu1 %v2188_v22  ;;  %v448_v18 = vsub.s32 1, %v443_v17  ;;  %v456_v19 = vsub.s32 3, %v443_v17  ;;  %v444_v20 = vsub.s32 0, %v443_v17  ;;  %v452_v21 = vsub.s32 2, %v443_v17  ;;  %v440_v22 = vld [vmem:[%s2665_s2] sm:$0xf] }
  0x9a   : > { %825 = vmatmul.mubr.bf16.gmra.mxu0 %v362_v23  ;;  %938 = vmatmul.mubr.bf16.gmra.mxu1 %v362_v23 }
  0x9b   : > { %834 = vmatprep.mubr.bf16.mxu0 %v365_v25  ;;  %947 = vmatprep.mubr.bf16.mxu1 %v365_v25  ;;  %v2549_v25 = vrot.slane %v440_v22, %v448_v18 }
  0x9c   : > { %1865 = vmatpush3.bf16.msra.mxu0 %v2189_v24  ;;  %1929 = vmatpush3.bf16.msra.mxu1 %v2190_v26  ;;  %v2551_v26 = vrot.slane %v440_v22, %v456_v19 }
  0x9d   : > { %1866 = vmatprep.subr.bf16.mxu0 %v2191_v27  ;;  %1930 = vmatprep.subr.bf16.mxu1 %v2192_v28  ;;  %v2553_v27 = vrot.slane %v440_v22, %v444_v20  ;;  %v2555_v28 = vrot.slane %v440_v22, %v452_v21 }
  0xa0   : > { %1867 = vmatpush3.bf16.msra.mxu0 %v2193_v33  ;;  %1931 = vmatpush3.bf16.msra.mxu1 %v2194_v34 }
  0xa1   : > { %1868 = vmatprep.subr.bf16.mxu0 %v2195_v35  ;;  %1932 = vmatprep.subr.bf16.mxu1 %v2196_v36 }
  0xa2   : > { %835 = vmatmul.mubr.bf16.gmra.mxu0 %v364_v37  ;;  %948 = vmatmul.mubr.bf16.gmra.mxu1 %v364_v37 }
  0xa3   : > { %844 = vmatprep.mubr.bf16.mxu0 %v367_v39  ;;  %957 = vmatprep.mubr.bf16.mxu1 %v367_v39 }
  0xa4   : > { %1869 = vmatpush3.bf16.msra.mxu0 %v2197_v38  ;;  %1933 = vmatpush3.bf16.msra.mxu1 %v2198_v40 }
  0xa5   : > { %1870 = vmatprep.subr.bf16.mxu0 %v2199_v4  ;;  %1934 = vmatprep.subr.bf16.mxu1 %v2200_v5 }
  0xa8   : > { %1871 = vmatpush3.bf16.msra.mxu0 %v2201_v6  ;;  %1935 = vmatpush3.bf16.msra.mxu1 %v2202_v7 }
  0xa9   : > { %1872 = vmatprep.subr.bf16.mxu0 %v2203_v8  ;;  %1936 = vmatprep.subr.bf16.mxu1 %v2204_v9 }
  0xaa   : > { %845 = vmatmul.mubr.bf16.gmra.mxu0 %v366_v45  ;;  %958 = vmatmul.mubr.bf16.gmra.mxu1 %v366_v45 }
  0xab   : > { %854 = vmatprep.mubr.bf16.mxu0 %v369_v46  ;;  %967 = vmatprep.mubr.bf16.mxu1 %v369_v46 }
  0xac   : > { %1873 = vmatpush3.bf16.msra.mxu0 %v2205_v10  ;;  %1937 = vmatpush3.bf16.msra.mxu1 %v2206_v11 }
  0xad   : > { %1874 = vmatprep.subr.bf16.mxu0 %v2207_v12  ;;  %1938 = vmatprep.subr.bf16.mxu1 %v2208_v13 }
  0xb0   : > { %1875 = vmatpush3.bf16.msra.mxu0 %v2209_v14  ;;  %1939 = vmatpush3.bf16.msra.mxu1 %v2210_v15 }
  0xb2   : > { %855 = vmatmul.mubr.bf16.gmra.mxu0 %v368_v51  ;;  %968 = vmatmul.mubr.bf16.gmra.mxu1 %v368_v51 }
  0xb3   : > { %864 = vmatprep.mubr.bf16.mxu0 %v371_v52  ;;  %977 = vmatprep.mubr.bf16.mxu1 %v371_v52 }
  0xba   : > { %865 = vmatmul.mubr.bf16.gmra.mxu0 %v370_v57  ;;  %978 = vmatmul.mubr.bf16.gmra.mxu1 %v370_v57 }
  0xbb   : > { %874 = vmatprep.mubr.bf16.mxu0 %v373_v58  ;;  %987 = vmatprep.mubr.bf16.mxu1 %v373_v58 }
  0xc2   : > { %875 = vmatmul.mubr.bf16.gmra.mxu0 %v372_v63  ;;  %988 = vmatmul.mubr.bf16.gmra.mxu1 %v372_v63 }
  0xc3   : > { %884 = vmatprep.mubr.bf16.mxu0 %v375_v0  ;;  %997 = vmatprep.mubr.bf16.mxu1 %v375_v0 }
  0xca   : > { %885 = vmatmul.mubr.bf16.gmra.mxu0 %v374_v3  ;;  %998 = vmatmul.mubr.bf16.gmra.mxu1 %v374_v3 }
 0x152   : > { %v816_v23 = vpop.f32.mrf.mxu0  ;;  %v929_v24 = vpop.f32.mrf.mxu1 }
 0x153   : > { %v817_v37 = vadd.f32 %v816_v23, %v2553_v27  ;;  %v930_v38 = vadd.f32 %v929_v24, %v2555_v28 }
 0x154   : > { %v818_v29 = vpop.f32.mrf.mxu0  ;;  %v931_v30 = vpop.f32.mrf.mxu1 }
 0x155   : > { %v819_v33 = vadd.f32 %v818_v29, %v2549_v25  ;;  %v932_v34 = vadd.f32 %v931_v30, %v2551_v26  ;;  %v1008_v51 = vmax.f32 %v817_v37, 0.0  ;;  %v1010_v52 = vmax.f32 %v930_v38, 0.0 }
 0x156   : > { %v820_v31 = vpop.f32.mrf.mxu0  ;;  %v933_v32 = vpop.f32.mrf.mxu1 }
 0x157   : > { %v821_v35 = vadd.f32 %v820_v31, %v2553_v27  ;;  %v934_v36 = vadd.f32 %v933_v32, %v2555_v28  ;;  %v1009_v47 = vmax.f32 %v819_v33, 0.0  ;;  %v1011_v48 = vmax.f32 %v932_v34, 0.0 }
 0x158   : > { %v822_v39 = vpop.f32.mrf.mxu0  ;;  %v935_v40 = vpop.f32.mrf.mxu1 }
 0x159   : > { %v823_v41 = vadd.f32 %v822_v39, %v2549_v25  ;;  %v936_v42 = vadd.f32 %v935_v40, %v2551_v26  ;;  %v1012_v43 = vmax.f32 %v821_v35, 0.0  ;;  %v1014_v44 = vmax.f32 %v934_v36, 0.0 }
 0x15a   : > { %v826_v45 = vpop.f32.mrf.mxu0  ;;  %v939_v46 = vpop.f32.mrf.mxu1 }
 0x15b   : > { %v1013_v49 = vmax.f32 %v823_v41, 0.0  ;;  %v1015_v50 = vmax.f32 %v936_v42, 0.0  ;;  %v1072_v57 = vpack.c.bf16 %v1012_v43, %v1008_v51  ;;  %v1074_v58 = vpack.c.bf16 %v1014_v44, %v1010_v52 }
 0x15c   : > { %v828_v53 = vpop.f32.mrf.mxu0  ;;  %v941_v54 = vpop.f32.mrf.mxu1  ;;  %v827_v1 = vadd.f32 %v826_v45, %v2553_v27  ;;  %v940_v2 = vadd.f32 %v939_v46, %v2555_v28 }
 0x15d   : > { %v1073_v55 = vpack.c.bf16 %v1013_v49, %v1009_v47  ;;  %v1075_v56 = vpack.c.bf16 %v1015_v50, %v1011_v48  ;;  %v829_v59 = vadd.f32 %v828_v53, %v2549_v25  ;;  %v942_v62 = vadd.f32 %v941_v54, %v2551_v26 }
 0x15e   : > { %v830_v60 = vpop.f32.mrf.mxu0  ;;  %v943_v61 = vpop.f32.mrf.mxu1  ;;  %v1016_v15 = vmax.f32 %v827_v1, 0.0  ;;  %v1018_v16 = vmax.f32 %v940_v2, 0.0 }
 0x15f   : > { %v831_v63 = vadd.f32 %v830_v60, %v2553_v27  ;;  %v944_v0 = vadd.f32 %v943_v61, %v2555_v28  ;;  %1399 = vmatprep.mubr.bf16.mxu0 %v1073_v55  ;;  %1496 = vmatprep.mubr.bf16.mxu1 %v1075_v56  ;;  %v1017_v11 = vmax.f32 %v829_v59, 0.0  ;;  %v1019_v12 = vmax.f32 %v942_v62, 0.0 }
 0x160   : > { %v832_v3 = vpop.f32.mrf.mxu0  ;;  %v945_v4 = vpop.f32.mrf.mxu1  ;;  %1400 = vmatmul.mubr.bf16.vlgmr.msra.gmra.mxu0 %v1072_v57  ;;  %1497 = vmatmul.mubr.bf16.vlgmr.msra.gmra.mxu1 %v1074_v58 }
 0x161   : > { %v833_v5 = vadd.f32 %v832_v3, %v2549_v25  ;;  %v946_v6 = vadd.f32 %v945_v4, %v2551_v26  ;;  %v1020_v7 = vmax.f32 %v831_v63, 0.0  ;;  %v1022_v8 = vmax.f32 %v944_v0, 0.0 }
 0x162   : > { %v836_v9 = vpop.f32.mrf.mxu0  ;;  %v949_v10 = vpop.f32.mrf.mxu1 }
 0x163   : > { %v1021_v13 = vmax.f32 %v833_v5, 0.0  ;;  %v1023_v14 = vmax.f32 %v946_v6, 0.0  ;;  %v1076_v21 = vpack.c.bf16 %v1020_v7, %v1016_v15  ;;  %v1078_v22 = vpack.c.bf16 %v1022_v8, %v1018_v16 }
 0x164   : > { %v838_v17 = vpop.f32.mrf.mxu0  ;;  %v951_v18 = vpop.f32.mrf.mxu1  ;;  %v837_v33 = vadd.f32 %v836_v9, %v2553_v27  ;;  %v950_v34 = vadd.f32 %v949_v10, %v2555_v28 }
 0x165   : > { %v1077_v19 = vpack.c.bf16 %v1021_v13, %v1017_v11  ;;  %v1079_v20 = vpack.c.bf16 %v1023_v14, %v1019_v12  ;;  %v839_v23 = vadd.f32 %v838_v17, %v2549_v25  ;;  %v952_v30 = vadd.f32 %v951_v18, %v2551_v26 }
 0x166   : > { %v840_v24 = vpop.f32.mrf.mxu0  ;;  %v953_v29 = vpop.f32.mrf.mxu1  ;;  %v1024_v47 = vmax.f32 %v837_v33, 0.0  ;;  %v1026_v48 = vmax.f32 %v950_v34, 0.0 }
 0x167   : > { %v841_v31 = vadd.f32 %v840_v24, %v2553_v27  ;;  %v954_v32 = vadd.f32 %v953_v29, %v2555_v28  ;;  %1407 = vmatprep.mubr.bf16.mxu0 %v1077_v19  ;;  %1504 = vmatprep.mubr.bf16.mxu1 %v1079_v20  ;;  %v1025_v43 = vmax.f32 %v839_v23, 0.0  ;;  %v1027_v44 = vmax.f32 %v952_v30, 0.0 }
 0x168   : > { %v842_v35 = vpop.f32.mrf.mxu0  ;;  %v955_v36 = vpop.f32.mrf.mxu1  ;;  %1408 = vmatmul.mubr.bf16.gmra.mxu0 %v1076_v21  ;;  %1505 = vmatmul.mubr.bf16.gmra.mxu1 %v1078_v22 }
 0x169   : > { %v843_v37 = vadd.f32 %v842_v35, %v2549_v25  ;;  %v956_v38 = vadd.f32 %v955_v36, %v2551_v26  ;;  %v1028_v39 = vmax.f32 %v841_v31, 0.0  ;;  %v1030_v40 = vmax.f32 %v954_v32, 0.0 }
 0x16a   : > { %v846_v41 = vpop.f32.mrf.mxu0  ;;  %v959_v42 = vpop.f32.mrf.mxu1 }
 0x16b   : > { %v1029_v45 = vmax.f32 %v843_v37, 0.0  ;;  %v1031_v46 = vmax.f32 %v956_v38, 0.0  ;;  %v1080_v53 = vpack.c.bf16 %v1028_v39, %v1024_v47  ;;  %v1082_v54 = vpack.c.bf16 %v1030_v40, %v1026_v48 }
 0x16c   : > { %v848_v49 = vpop.f32.mrf.mxu0  ;;  %v961_v50 = vpop.f32.mrf.mxu1  ;;  %v847_v61 = vadd.f32 %v846_v41, %v2553_v27  ;;  %v960_v62 = vadd.f32 %v959_v42, %v2555_v28 }
 0x16d   : > { %v1081_v51 = vpack.c.bf16 %v1029_v45, %v1025_v43  ;;  %v1083_v52 = vpack.c.bf16 %v1031_v46, %v1027_v44  ;;  %v849_v55 = vadd.f32 %v848_v49, %v2549_v25  ;;  %v962_v58 = vadd.f32 %v961_v50, %v2551_v26 }
 0x16e   : > { %v850_v56 = vpop.f32.mrf.mxu0  ;;  %v963_v57 = vpop.f32.mrf.mxu1  ;;  %v1032_v11 = vmax.f32 %v847_v61, 0.0  ;;  %v1034_v12 = vmax.f32 %v960_v62, 0.0 }
 0x16f   : > { %v851_v59 = vadd.f32 %v850_v56, %v2553_v27  ;;  %v964_v60 = vadd.f32 %v963_v57, %v2555_v28  ;;  %1415 = vmatprep.mubr.bf16.mxu0 %v1081_v51  ;;  %1512 = vmatprep.mubr.bf16.mxu1 %v1083_v52  ;;  %v1033_v7 = vmax.f32 %v849_v55, 0.0  ;;  %v1035_v8 = vmax.f32 %v962_v58, 0.0 }
 0x170   : > { %v852_v63 = vpop.f32.mrf.mxu0  ;;  %v965_v0 = vpop.f32.mrf.mxu1  ;;  %1416 = vmatmul.mubr.bf16.gmra.mxu0 %v1080_v53  ;;  %1513 = vmatmul.mubr.bf16.gmra.mxu1 %v1082_v54 }
 0x171   : > { %v853_v1 = vadd.f32 %v852_v63, %v2549_v25  ;;  %v966_v2 = vadd.f32 %v965_v0, %v2551_v26  ;;  %v1036_v3 = vmax.f32 %v851_v59, 0.0  ;;  %v1038_v4 = vmax.f32 %v964_v60, 0.0 }
 0x172   : > { %v856_v5 = vpop.f32.mrf.mxu0  ;;  %v969_v6 = vpop.f32.mrf.mxu1 }
 0x173   : > { %v1037_v9 = vmax.f32 %v853_v1, 0.0  ;;  %v1039_v10 = vmax.f32 %v966_v2, 0.0  ;;  %v1084_v17 = vpack.c.bf16 %v1036_v3, %v1032_v11  ;;  %v1086_v18 = vpack.c.bf16 %v1038_v4, %v1034_v12 }
 0x174   : > { %v858_v13 = vpop.f32.mrf.mxu0  ;;  %v971_v14 = vpop.f32.mrf.mxu1  ;;  %v857_v29 = vadd.f32 %v856_v5, %v2553_v27  ;;  %v970_v30 = vadd.f32 %v969_v6, %v2555_v28 }
 0x175   : > { %v1085_v15 = vpack.c.bf16 %v1037_v9, %v1033_v7  ;;  %v1087_v16 = vpack.c.bf16 %v1039_v10, %v1035_v8  ;;  %v859_v19 = vadd.f32 %v858_v13, %v2549_v25  ;;  %v972_v22 = vadd.f32 %v971_v14, %v2551_v26 }
 0x176   : > { %v860_v20 = vpop.f32.mrf.mxu0  ;;  %v973_v21 = vpop.f32.mrf.mxu1  ;;  %v1040_v43 = vmax.f32 %v857_v29, 0.0  ;;  %v1042_v44 = vmax.f32 %v970_v30, 0.0 }
 0x177   : > { %v861_v23 = vadd.f32 %v860_v20, %v2553_v27  ;;  %v974_v24 = vadd.f32 %v973_v21, %v2555_v28  ;;  %1423 = vmatprep.mubr.bf16.mxu0 %v1085_v15  ;;  %1520 = vmatprep.mubr.bf16.mxu1 %v1087_v16  ;;  %v1041_v39 = vmax.f32 %v859_v19, 0.0  ;;  %v1043_v40 = vmax.f32 %v972_v22, 0.0 }
 0x178   : > { %v862_v31 = vpop.f32.mrf.mxu0  ;;  %v975_v32 = vpop.f32.mrf.mxu1  ;;  %1424 = vmatmul.mubr.bf16.gmra.mxu0 %v1084_v17  ;;  %1521 = vmatmul.mubr.bf16.gmra.mxu1 %v1086_v18 }
 0x179   : > { %v863_v33 = vadd.f32 %v862_v31, %v2549_v25  ;;  %v976_v34 = vadd.f32 %v975_v32, %v2551_v26  ;;  %v1044_v35 = vmax.f32 %v861_v23, 0.0  ;;  %v1046_v36 = vmax.f32 %v974_v24, 0.0 }
 0x17a   : > { %v866_v37 = vpop.f32.mrf.mxu0  ;;  %v979_v38 = vpop.f32.mrf.mxu1 }
 0x17b   : > { %v1045_v41 = vmax.f32 %v863_v33, 0.0  ;;  %v1047_v42 = vmax.f32 %v976_v34, 0.0  ;;  %v1088_v49 = vpack.c.bf16 %v1044_v35, %v1040_v43  ;;  %v1090_v50 = vpack.c.bf16 %v1046_v36, %v1042_v44 }
 0x17c   : > { %v868_v45 = vpop.f32.mrf.mxu0  ;;  %v981_v46 = vpop.f32.mrf.mxu1  ;;  %v867_v57 = vadd.f32 %v866_v37, %v2553_v27  ;;  %v980_v58 = vadd.f32 %v979_v38, %v2555_v28 }
 0x17d   : > { %v1089_v47 = vpack.c.bf16 %v1045_v41, %v1041_v39  ;;  %v1091_v48 = vpack.c.bf16 %v1047_v42, %v1043_v40  ;;  %v869_v51 = vadd.f32 %v868_v45, %v2549_v25  ;;  %v982_v54 = vadd.f32 %v981_v46, %v2551_v26 }
 0x17e   : > { %v870_v52 = vpop.f32.mrf.mxu0  ;;  %v983_v53 = vpop.f32.mrf.mxu1  ;;  %v1048_v7 = vmax.f32 %v867_v57, 0.0  ;;  %v1050_v8 = vmax.f32 %v980_v58, 0.0 }
 0x17f   : > { %v871_v55 = vadd.f32 %v870_v52, %v2553_v27  ;;  %v984_v56 = vadd.f32 %v983_v53, %v2555_v28  ;;  %1431 = vmatprep.mubr.bf16.mxu0 %v1089_v47  ;;  %1528 = vmatprep.mubr.bf16.mxu1 %v1091_v48  ;;  %v1049_v3 = vmax.f32 %v869_v51, 0.0  ;;  %v1051_v4 = vmax.f32 %v982_v54, 0.0 }
 0x180   : > { %v872_v59 = vpop.f32.mrf.mxu0  ;;  %v985_v60 = vpop.f32.mrf.mxu1  ;;  %1432 = vmatmul.mubr.bf16.gmra.mxu0 %v1088_v49  ;;  %1529 = vmatmul.mubr.bf16.gmra.mxu1 %v1090_v50 }
 0x181   : > { %v873_v61 = vadd.f32 %v872_v59, %v2549_v25  ;;  %v986_v62 = vadd.f32 %v985_v60, %v2551_v26  ;;  %v1052_v63 = vmax.f32 %v871_v55, 0.0  ;;  %v1054_v0 = vmax.f32 %v984_v56, 0.0 }
 0x182   : > { %v876_v1 = vpop.f32.mrf.mxu0  ;;  %v989_v2 = vpop.f32.mrf.mxu1 }
 0x183   : > { %v1053_v5 = vmax.f32 %v873_v61, 0.0  ;;  %v1055_v6 = vmax.f32 %v986_v62, 0.0  ;;  %v1092_v13 = vpack.c.bf16 %v1052_v63, %v1048_v7  ;;  %v1094_v14 = vpack.c.bf16 %v1054_v0, %v1050_v8  ;;  %v2624_v7 = vld [vmem:[%s2667_s4] ss:$0 sm:$0xff] }
 0x184   : > { %v878_v9 = vpop.f32.mrf.mxu0  ;;  %v991_v10 = vpop.f32.mrf.mxu1  ;;  %v877_v21 = vadd.f32 %v876_v1, %v2553_v27  ;;  %v990_v22 = vadd.f32 %v989_v2, %v2555_v28 }
 0x185   : > { %v1093_v11 = vpack.c.bf16 %v1053_v5, %v1049_v3  ;;  %v1095_v12 = vpack.c.bf16 %v1055_v6, %v1051_v4  ;;  %v879_v15 = vadd.f32 %v878_v9, %v2549_v25  ;;  %v992_v18 = vadd.f32 %v991_v10, %v2551_v26 }
 0x186   : > { %v880_v16 = vpop.f32.mrf.mxu0  ;;  %v993_v17 = vpop.f32.mrf.mxu1  ;;  %v1056_v39 = vmax.f32 %v877_v21, 0.0  ;;  %v1058_v40 = vmax.f32 %v990_v22, 0.0 }
 0x187   : > { %v881_v19 = vadd.f32 %v880_v16, %v2553_v27  ;;  %v994_v20 = vadd.f32 %v993_v17, %v2555_v28  ;;  %1439 = vmatprep.mubr.bf16.mxu0 %v1093_v11  ;;  %1536 = vmatprep.mubr.bf16.mxu1 %v1095_v12  ;;  %v1057_v35 = vmax.f32 %v879_v15, 0.0  ;;  %v1059_v36 = vmax.f32 %v992_v18, 0.0 }
 0x188   : > { %v882_v23 = vpop.f32.mrf.mxu0  ;;  %v995_v24 = vpop.f32.mrf.mxu1  ;;  %1440 = vmatmul.mubr.bf16.gmra.mxu0 %v1092_v13  ;;  %1537 = vmatmul.mubr.bf16.gmra.mxu1 %v1094_v14 }
 0x189   : > { %v883_v29 = vadd.f32 %v882_v23, %v2549_v25  ;;  %v996_v30 = vadd.f32 %v995_v24, %v2551_v26  ;;  %v1060_v31 = vmax.f32 %v881_v19, 0.0  ;;  %v1062_v32 = vmax.f32 %v994_v20, 0.0 }
 0x18a   : > { %v886_v33 = vpop.f32.mrf.mxu0  ;;  %v999_v34 = vpop.f32.mrf.mxu1 }
 0x18b   : > { %v1061_v37 = vmax.f32 %v883_v29, 0.0  ;;  %v1063_v38 = vmax.f32 %v996_v30, 0.0  ;;  %v1096_v45 = vpack.c.bf16 %v1060_v31, %v1056_v39  ;;  %v1098_v46 = vpack.c.bf16 %v1062_v32, %v1058_v40 }
 0x18c   : > { %v888_v41 = vpop.f32.mrf.mxu0  ;;  %v1001_v42 = vpop.f32.mrf.mxu1  ;;  %v887_v53 = vadd.f32 %v886_v33, %v2553_v27  ;;  %v1000_v54 = vadd.f32 %v999_v34, %v2555_v28 }
 0x18d   : > { %v1097_v43 = vpack.c.bf16 %v1061_v37, %v1057_v35  ;;  %v1099_v44 = vpack.c.bf16 %v1063_v38, %v1059_v36  ;;  %v889_v47 = vadd.f32 %v888_v41, %v2549_v25  ;;  %v1002_v50 = vadd.f32 %v1001_v42, %v2551_v26 }
 0x18e   : > { %v890_v48 = vpop.f32.mrf.mxu0  ;;  %v1003_v49 = vpop.f32.mrf.mxu1  ;;  %v1064_v1 = vmax.f32 %v887_v53, 0.0  ;;  %v1066_v2 = vmax.f32 %v1000_v54, 0.0 }
 0x18f   : > { %v891_v51 = vadd.f32 %v890_v48, %v2553_v27  ;;  %v1004_v52 = vadd.f32 %v1003_v49, %v2555_v28  ;;  %1447 = vmatprep.mubr.bf16.mxu0 %v1097_v43  ;;  %1544 = vmatprep.mubr.bf16.mxu1 %v1099_v44  ;;  %v1065_v61 = vmax.f32 %v889_v47, 0.0  ;;  %v1067_v62 = vmax.f32 %v1002_v50, 0.0 }
 0x190   : > { %v892_v55 = vpop.f32.mrf.mxu0  ;;  %v1005_v56 = vpop.f32.mrf.mxu1  ;;  %1448 = vmatmul.mubr.bf16.gmra.mxu0 %v1096_v45  ;;  %1545 = vmatmul.mubr.bf16.gmra.mxu1 %v1098_v46 }
 0x191   : > { %v893_v57 = vadd.f32 %v892_v55, %v2549_v25  ;;  %v1006_v58 = vadd.f32 %v1005_v56, %v2551_v26  ;;  %v1068_v59 = vmax.f32 %v891_v51, 0.0  ;;  %v1070_v60 = vmax.f32 %v1004_v52, 0.0 }
 0x193   : > { %v1069_v63 = vmax.f32 %v893_v57, 0.0  ;;  %v1071_v0 = vmax.f32 %v1006_v58, 0.0  ;;  %v1100_v4 = vpack.c.bf16 %v1068_v59, %v1064_v1  ;;  %v1102_v28 = vpack.c.bf16 %v1070_v60, %v1066_v2 }
 0x195   : > { %v1101_v3 = vpack.c.bf16 %v1069_v63, %v1065_v61  ;;  %v1103_v27 = vpack.c.bf16 %v1071_v0, %v1067_v62 }
 0x197   : > { %1455 = vmatprep.mubr.bf16.mxu0 %v1101_v3  ;;  %1552 = vmatprep.mubr.bf16.mxu1 %v1103_v27 }
 0x198   : > { %1456 = vmatmul.mubr.bf16.gmra.mxu0 %v1100_v4  ;;  %1553 = vmatmul.mubr.bf16.gmra.mxu1 %v1102_v28 }
 0x220   : > { %v1876_v5 = vpop.f32.mrf.mxu0  ;;  %v1940_v25 = vpop.f32.mrf.mxu1 }
 0x222   : > { %v1877_v6 = vpop.f32.mrf.mxu0  ;;  %v1941_v26 = vpop.f32.mrf.mxu1 }
 0x223   : > { %v1878_v8 = vadd.f32 %v1877_v6, %v1876_v5  ;;  %v1942_v11 = vadd.f32 %v1941_v26, %v1940_v25 }
 0x224   : > { %v1879_v9 = vpop.f32.mrf.mxu0  ;;  %v1943_v10 = vpop.f32.mrf.mxu1 }
 0x225   : > { %v1402_v12 = vadd.f32 %v1878_v8, %v2624_v7 }
 0x226   : > { %v1880_v13 = vpop.f32.mrf.mxu0  ;;  %v1944_v14 = vpop.f32.mrf.mxu1 }
 0x227   : > { %v1881_v15 = vadd.f32 %v1880_v13, %v1879_v9  ;;  %v1499_v16 = vadd.f32 %v1942_v11, %v1402_v12  ;;  %v1945_v20 = vadd.f32 %v1944_v14, %v1943_v10 }
 0x228   : > { %v1882_v17 = vpop.f32.mrf.mxu0  ;;  %v1946_v18 = vpop.f32.mrf.mxu1 }
 0x229   : > { %v1405_v19 = vadd.f32 %v1881_v15, %v2624_v7  ;;  %v1561_v21 = vmax.f32 %v1499_v16, 0.0 }
 0x22a   : > { %v1883_v22 = vpop.f32.mrf.mxu0  ;;  %v1947_v23 = vpop.f32.mrf.mxu1 }
 0x22b   : > { %v1884_v24 = vadd.f32 %v1883_v22, %v1882_v17  ;;  %1577 = vxpose.xlu0.b32.start [1/16] %v1561_v21, 128  ;;  %v1502_v29 = vadd.f32 %v1945_v20, %v1405_v19  ;;  %v1948_v33 = vadd.f32 %v1947_v23, %v1946_v18 }
 0x22c   : > { %v1885_v30 = vpop.f32.mrf.mxu0  ;;  %v1949_v31 = vpop.f32.mrf.mxu1 }
 0x22d   : > { %v1410_v32 = vadd.f32 %v1884_v24, %v2624_v7  ;;  %v1562_v34 = vmax.f32 %v1502_v29, 0.0 }
 0x22e   : > { %v1886_v35 = vpop.f32.mrf.mxu0  ;;  %v1950_v36 = vpop.f32.mrf.mxu1 }
 0x22f   : > { %v1887_v37 = vadd.f32 %v1886_v35, %v1885_v30  ;;  %1578 = vxpose.xlu0.b32.cont [2/16] %v1562_v34, 128  ;;  %v1507_v38 = vadd.f32 %v1948_v33, %v1410_v32  ;;  %v1951_v42 = vadd.f32 %v1950_v36, %v1949_v31 }
 0x230   : > { %v1888_v39 = vpop.f32.mrf.mxu0  ;;  %v1952_v40 = vpop.f32.mrf.mxu1 }
 0x231   : > { %v1413_v41 = vadd.f32 %v1887_v37, %v2624_v7  ;;  %v1563_v43 = vmax.f32 %v1507_v38, 0.0 }
 0x232   : > { %v1889_v44 = vpop.f32.mrf.mxu0  ;;  %v1953_v45 = vpop.f32.mrf.mxu1 }
 0x233   : > { %v1890_v46 = vadd.f32 %v1889_v44, %v1888_v39  ;;  %1579 = vxpose.xlu0.b32.cont [3/16] %v1563_v43, 128  ;;  %v1510_v47 = vadd.f32 %v1951_v42, %v1413_v41  ;;  %v1954_v51 = vadd.f32 %v1953_v45, %v1952_v40 }
 0x234   : > { %v1891_v48 = vpop.f32.mrf.mxu0  ;;  %v1955_v49 = vpop.f32.mrf.mxu1 }
 0x235   : > { %v1418_v50 = vadd.f32 %v1890_v46, %v2624_v7  ;;  %v1564_v52 = vmax.f32 %v1510_v47, 0.0 }
 0x236   : > { %v1892_v53 = vpop.f32.mrf.mxu0  ;;  %v1956_v54 = vpop.f32.mrf.mxu1 }
 0x237   : > { %v1893_v55 = vadd.f32 %v1892_v53, %v1891_v48  ;;  %1580 = vxpose.xlu0.b32.cont [4/16] %v1564_v52, 128  ;;  %v1515_v56 = vadd.f32 %v1954_v51, %v1418_v50  ;;  %v1957_v60 = vadd.f32 %v1956_v54, %v1955_v49 }
 0x238   : > { %v1894_v57 = vpop.f32.mrf.mxu0  ;;  %v1958_v58 = vpop.f32.mrf.mxu1 }
 0x239   : > { %v1421_v59 = vadd.f32 %v1893_v55, %v2624_v7  ;;  %v1565_v61 = vmax.f32 %v1515_v56, 0.0 }
 0x23a   : > { %v1895_v62 = vpop.f32.mrf.mxu0  ;;  %v1959_v63 = vpop.f32.mrf.mxu1 }
 0x23b   : > { %v1896_v0 = vadd.f32 %v1895_v62, %v1894_v57  ;;  %1581 = vxpose.xlu0.b32.cont [5/16] %v1565_v61, 128  ;;  %v1518_v1 = vadd.f32 %v1957_v60, %v1421_v59  ;;  %v1960_v4 = vadd.f32 %v1959_v63, %v1958_v58 }
 0x23c   : > { %v1897_v2 = vpop.f32.mrf.mxu0  ;;  %v1961_v3 = vpop.f32.mrf.mxu1 }
 0x23d   : > { %v1426_v27 = vadd.f32 %v1896_v0, %v2624_v7  ;;  %v1566_v28 = vmax.f32 %v1518_v1, 0.0 }
 0x23e   : > { %v1898_v5 = vpop.f32.mrf.mxu0  ;;  %v1962_v25 = vpop.f32.mrf.mxu1 }
 0x23f   : > { %v1899_v6 = vadd.f32 %v1898_v5, %v1897_v2  ;;  %1582 = vxpose.xlu0.b32.cont [6/16] %v1566_v28, 128  ;;  %v1523_v26 = vadd.f32 %v1960_v4, %v1426_v27  ;;  %v1963_v11 = vadd.f32 %v1962_v25, %v1961_v3 }
 0x240   : > { %v1900_v8 = vpop.f32.mrf.mxu0  ;;  %v1964_v9 = vpop.f32.mrf.mxu1 }
 0x241   : > { %v1429_v10 = vadd.f32 %v1899_v6, %v2624_v7  ;;  %v1567_v12 = vmax.f32 %v1523_v26, 0.0 }
 0x242   : > { %v1901_v13 = vpop.f32.mrf.mxu0  ;;  %v1965_v14 = vpop.f32.mrf.mxu1 }
 0x243   : > { %v1902_v15 = vadd.f32 %v1901_v13, %v1900_v8  ;;  %1583 = vxpose.xlu0.b32.cont [7/16] %v1567_v12, 128  ;;  %v1526_v16 = vadd.f32 %v1963_v11, %v1429_v10  ;;  %v1966_v20 = vadd.f32 %v1965_v14, %v1964_v9 }
 0x244   : > { %v1903_v17 = vpop.f32.mrf.mxu0  ;;  %v1967_v18 = vpop.f32.mrf.mxu1 }
 0x245   : > { %v1434_v19 = vadd.f32 %v1902_v15, %v2624_v7  ;;  %v1568_v21 = vmax.f32 %v1526_v16, 0.0 }
 0x246   : > { %v1904_v22 = vpop.f32.mrf.mxu0  ;;  %v1968_v23 = vpop.f32.mrf.mxu1 }
 0x247   : > { %v1905_v24 = vadd.f32 %v1904_v22, %v1903_v17  ;;  %1584 = vxpose.xlu0.b32.cont [8/16] %v1568_v21, 128  ;;  %v1531_v29 = vadd.f32 %v1966_v20, %v1434_v19  ;;  %v1969_v33 = vadd.f32 %v1968_v23, %v1967_v18  ;;  %v2342_v22 = vmov 0.0  }
 0x248   : > { %v1906_v30 = vpop.f32.mrf.mxu0  ;;  %v1970_v31 = vpop.f32.mrf.mxu1  ;;  %1997 = vmatprep.subr.bf16.mxu0 %v2342_v22  ;;  %2013 = vmatprep.mubr.msk.bf16.mxu0 %vm2343_vm0, %v2342_v22 }
 0x249   : > { %v1437_v32 = vadd.f32 %v1905_v24, %v2624_v7  ;;  %v1569_v34 = vmax.f32 %v1531_v29, 0.0 }
 0x24a   : > { %v1907_v35 = vpop.f32.mrf.mxu0  ;;  %v1971_v36 = vpop.f32.mrf.mxu1 }
 0x24b   : > { %v1908_v37 = vadd.f32 %v1907_v35, %v1906_v30  ;;  %1585 = vxpose.xlu0.b32.cont [9/16] %v1569_v34, 128  ;;  %v1534_v38 = vadd.f32 %v1969_v33, %v1437_v32  ;;  %v1972_v42 = vadd.f32 %v1971_v36, %v1970_v31 }
 0x24c   : > { %v1909_v39 = vpop.f32.mrf.mxu0  ;;  %v1973_v40 = vpop.f32.mrf.mxu1 }
 0x24d   : > { %v1442_v41 = vadd.f32 %v1908_v37, %v2624_v7  ;;  %v1570_v43 = vmax.f32 %v1534_v38, 0.0 }
 0x24e   : > { %v1910_v44 = vpop.f32.mrf.mxu0  ;;  %v1974_v45 = vpop.f32.mrf.mxu1 }
 0x24f   : > { %v1911_v46 = vadd.f32 %v1910_v44, %v1909_v39  ;;  %1586 = vxpose.xlu0.b32.cont [10/16] %v1570_v43, 128  ;;  %v1539_v47 = vadd.f32 %v1972_v42, %v1442_v41  ;;  %v1975_v51 = vadd.f32 %v1974_v45, %v1973_v40 }
 0x250   : > { %v1912_v48 = vpop.f32.mrf.mxu0  ;;  %v1976_v49 = vpop.f32.mrf.mxu1 }
 0x251   : > { %v1445_v50 = vadd.f32 %v1911_v46, %v2624_v7  ;;  %v1571_v52 = vmax.f32 %v1539_v47, 0.0 }
 0x252   : > { %v1913_v53 = vpop.f32.mrf.mxu0  ;;  %v1977_v54 = vpop.f32.mrf.mxu1 }
 0x253   : > { %v1914_v55 = vadd.f32 %v1913_v53, %v1912_v48  ;;  %1587 = vxpose.xlu0.b32.cont [11/16] %v1571_v52, 128  ;;  %v1542_v56 = vadd.f32 %v1975_v51, %v1445_v50  ;;  %v1978_v60 = vadd.f32 %v1977_v54, %v1976_v49  ;;  %v1617_v50 = vld [vmem:[%s2668_s5] sm:$0x1]  ;;  %v1619_v51 = vstv %s1618_s20 }
 0x254   : > { %v1915_v57 = vpop.f32.mrf.mxu0  ;;  %v1979_v58 = vpop.f32.mrf.mxu1 }
 0x255   : > { %v1450_v59 = vadd.f32 %v1914_v55, %v2624_v7  ;;  %v1572_v61 = vmax.f32 %v1542_v56, 0.0 }
 0x256   : > { %v1916_v62 = vpop.f32.mrf.mxu0  ;;  %v1980_v63 = vpop.f32.mrf.mxu1 }
 0x257   : > { %v1917_v0 = vadd.f32 %v1916_v62, %v1915_v57  ;;  %1588 = vxpose.xlu0.b32.cont [12/16] %v1572_v61, 128  ;;  %v1547_v1 = vadd.f32 %v1978_v60, %v1450_v59  ;;  %v1981_v4 = vadd.f32 %v1980_v63, %v1979_v58 }
 0x258   : > { %v1918_v2 = vpop.f32.mrf.mxu0  ;;  %v1982_v3 = vpop.f32.mrf.mxu1 }
 0x259   : > { %v1453_v27 = vadd.f32 %v1917_v0, %v2624_v7  ;;  %v1573_v28 = vmax.f32 %v1547_v1, 0.0 }
 0x25a   : > { %v1919_v5 = vpop.f32.mrf.mxu0  ;;  %v1983_v25 = vpop.f32.mrf.mxu1 }
 0x25b   : > { %v1920_v6 = vadd.f32 %v1919_v5, %v1918_v2  ;;  %1589 = vxpose.xlu0.b32.cont [13/16] %v1573_v28, 128  ;;  %v1550_v26 = vadd.f32 %v1981_v4, %v1453_v27  ;;  %v1984_v11 = vadd.f32 %v1983_v25, %v1982_v3 }
 0x25c   : > { %v1921_v8 = vpop.f32.mrf.mxu0  ;;  %v1985_v9 = vpop.f32.mrf.mxu1 }
 0x25d   : > { %v1458_v10 = vadd.f32 %v1920_v6, %v2624_v7  ;;  %v1574_v12 = vmax.f32 %v1550_v26, 0.0 }
 0x25e   : > { %v1922_v13 = vpop.f32.mrf.mxu0  ;;  %v1986_v14 = vpop.f32.mrf.mxu1 }
 0x25f   : > { %v1923_v15 = vadd.f32 %v1922_v13, %v1921_v8  ;;  %1590 = vxpose.xlu0.b32.cont [14/16] %v1574_v12, 128  ;;  %v1555_v16 = vadd.f32 %v1984_v11, %v1458_v10  ;;  %v1987_v18 = vadd.f32 %v1986_v14, %v1985_v9 }
 0x261   : > { %v1461_v17 = vadd.f32 %v1923_v15, %v2624_v7  ;;  %v1575_v19 = vmax.f32 %v1555_v16, 0.0 }
 0x263   : > { %1591 = vxpose.xlu0.b32.cont [15/16] %v1575_v19, 128  ;;  %v1558_v20 = vadd.f32 %v1987_v18, %v1461_v17 }
 0x265   : > { %v1576_v21 = vmax.f32 %v1558_v20, 0.0 }
 0x267   : > { %1592 = vxpose.xlu0.b32.end [16/16] %v1576_v21, 128 }
 0x2a7   : > { %v1593_v23 = vpop.trf.xlu0 }
 0x2ab   : > { %v1594_v24 = vpop.trf.xlu0 }
 0x2ac   : > { %v1609_v29 = vpack.c.bf16 %v1594_v24, %v1593_v23 }
 0x2af   : > { %v1595_v30 = vpop.trf.xlu0 }
 0x2b3   : > { %v1596_v31 = vpop.trf.xlu0 }
 0x2b4   : > { %v1610_v32 = vpack.c.bf16 %v1596_v31, %v1595_v30 }
 0x2b7   : > { %v1597_v33 = vpop.trf.xlu0 }
 0x2bb   : > { %v1598_v34 = vpop.trf.xlu0 }
 0x2bc   : > { %v1611_v49 = vpack.c.bf16 %v1598_v34, %v1597_v33 }
 0x2bf   : > { %v1599_v35 = vpop.trf.xlu0 }
 0x2c3   : > { %v1600_v7 = vpop.trf.xlu0 }
 0x2c4   : > { %v1612_v48 = vpack.c.bf16 %v1600_v7, %v1599_v35 }
 0x2c7   : > { %v1601_v36 = vpop.trf.xlu0 }
 0x2cb   : > { %v1602_v37 = vpop.trf.xlu0 }
 0x2cc   : > { %v1613_v47 = vpack.c.bf16 %v1602_v37, %v1601_v36 }
 0x2cf   : > { %v1603_v38 = vpop.trf.xlu0 }
 0x2d3   : > { %v1604_v39 = vpop.trf.xlu0 }
 0x2d4   : > { %v1614_v46 = vpack.c.bf16 %v1604_v39, %v1603_v38 }
 0x2d7   : > { %v1605_v40 = vpop.trf.xlu0 }
 0x2db   : > { %v1606_v41 = vpop.trf.xlu0 }
 0x2dc   : > { %v1615_v45 = vpack.c.bf16 %v1606_v41, %v1605_v40 }
 0x2df   : > { %v1607_v42 = vpop.trf.xlu0 }
 0x2e3   : > { %v1608_v43 = vpop.trf.xlu0 }
 0x2e4   : > { %v1616_v44 = vpack.c.bf16 %v1608_v43, %v1607_v42 }
 0x2e6   : > { %1998 = vmatpush3.bf16.msra.mxu0 %v1616_v44 }
 0x2e7   : > { %1999 = vmatprep.subr.bf16.mxu0 %v2342_v22 }
 0x2ea   : > { %2000 = vmatpush3.bf16.msra.mxu0 %v1615_v45 }
 0x2eb   : > { %2001 = vmatprep.subr.bf16.mxu0 %v2342_v22 }
 0x2ee   : > { %2002 = vmatpush3.bf16.msra.mxu0 %v1614_v46 }
 0x2ef   : > { %2003 = vmatprep.subr.bf16.mxu0 %v2342_v22 }
 0x2f2   : > { %2004 = vmatpush3.bf16.msra.mxu0 %v1613_v47 }
 0x2f3   : > { %2005 = vmatprep.subr.bf16.mxu0 %v2342_v22 }
 0x2f6   : > { %2006 = vmatpush3.bf16.msra.mxu0 %v1612_v48 }
 0x2f7   : > { %2007 = vmatprep.subr.bf16.mxu0 %v2342_v22 }
 0x2fa   : > { %2008 = vmatpush3.bf16.msra.mxu0 %v1611_v49 }
 0x2fb   : > { %2009 = vmatprep.subr.bf16.mxu0 %v2342_v22 }
 0x2fe   : > { %2010 = vmatpush3.bf16.msra.mxu0 %v1610_v32 }
 0x2ff   : > { %2011 = vmatprep.subr.bf16.mxu0 %v2342_v22 }
 0x302   : > { %2012 = vmatpush3.bf16.msra.mxu0 %v1609_v29 }
 0x305   : > { %2014 = vmatmul.mubr.bf16.vlgmr.msra.gmra.mxu0 %v1617_v50 }
 0x3c5   : > { %v1654_v52 = vpop.f32.mrf.mxu0 }
 0x3c6   : > { %v1655_v53 = vadd.f32 %v1654_v52, %v1619_v51 }
 0x3c7   : > { %v2015_v54 = vpop.f32.mrf.mxu0 }
 0x3c8   : > { %v1855_v55 = vmul.f32 -1.442695, %v1655_v53 }
 0x3c9   : > { %v1657_v56 = vpop.f32.mrf.mxu0 }
 0x3ca   : > { %2211 = vpow2.f32 %v1855_v55 }
 0x3cb   : > { %v2016_v57 = vpop.f32.mrf.mxu0 }
 0x3d7   : > { %v2212_v58 = vpop.eup %2211 }
 0x3d8   : > { %v1663_v59 = vadd.f32 1.0, %v2212_v58 }
 0x3da   : > { %2213 = vrcp.f32 %v1663_v59 }
 0x3e7   : > { %v2214_v60 = vpop.eup %2213 }
 0x3e8   : > { %1666 = vst [vmem:[%s326_s26] sm:$0x1] %v2214_v60 }
 0x3e9 PF: > { %p19_p12 = scmp.ge.s32.totalorder %s2452_s24, 4   ;;  %s2682_s26 = smov %s2325_s27 }
 0x3ea   : > { %s2683_s27 = smov %s2329_s28  ;;  %s2684_s28 = smov %s2461_s9 }
 0x3eb   : > { %s2685_s29 = smov %s2452_s24  ;;  %21 = sbr.rel (!%p19_p12) target bundleno = 6 (0x6), region = 96 }
 0x3f0   :  { %1684 = vsyncpa [#allocation4], 1 }
 0x3f1   :  { %1686 = vsyncpa [#allocation4 + $0x1], 1 }
 0x3f2   :  { %1687 = vsyncpa [#allocation6], 1 }

</bundles_post_ra>
